<compile_context>
chip_gen: v5e
topology: v5e:2x2
jax: 0.10.0
libtpu: 0.0.40
codegen_flags: <defaults>
</compile_context>

<pallas_src>
import functools
import math

import jax
import jax.numpy as jnp
import numpy as np
from jax import lax
from jax.experimental import pallas as pl
from jax.experimental.pallas import tpu as pltpu


# ----------------------------------------------------------------------------
# Tiling helpers
# ----------------------------------------------------------------------------
def _pick_hw_tile(hw):
    """Largest lane-aligned HW tile; fall back to the full extent."""
    for t in (512, 256, 128):
        if hw % t == 0:
            return t
    return hw


def _compiler_params():
    # Both grid axes are independent -> parallel (megacore / v7x 2-TC sharding).
    # Explicit VMEM budget safe on every chip (v7x physical = 64 MiB).
    return pltpu.CompilerParams(
        dimension_semantics=("parallel", "parallel"),
        vmem_limit_bytes=32 * 1024 * 1024,
    )


# ----------------------------------------------------------------------------
# Kernel 1: fused encoder
#   stem (K=3 -> three broadcast FMAs on the VPU, no MXU) + relu +
#   box-size FiLM scale + one MXU matmul with [w_cls || w_den]^T
#   (N = HW tile, lane-dense)
# ----------------------------------------------------------------------------
def _encoder_kernel(pooled_ref, bsc_ref, wstem_t_ref, wcd_t_ref,
                    cls_ref, den_ref, *, c):
    p = pooled_ref[0]                          # (3, thw)  f32
    w = wstem_t_ref[...]                       # (C, 3)    f32
    fea = (w[:, 0:1] * p[0:1, :]
           + w[:, 1:2] * p[1:2, :]
           + w[:, 2:3] * p[2:3, :])            # (C, thw)  three broadcast FMAs
    fea = jnp.maximum(fea, 0.0) * bsc_ref[0]   # per-batch channel FiLM (C,1) bcast
    cd = jnp.dot(wcd_t_ref[...], fea.astype(jnp.bfloat16),
                 preferred_element_type=jnp.float32)      # (2C, thw)
    cd = jnp.maximum(cd, 0.0)
    cls_ref[0] = cd[:c, :].astype(cls_ref.dtype)
    den_ref[0] = cd[c:, :].astype(den_ref.dtype)


def encoder_apply(pooled, bs_scale, wstem_t, wcd_t):
    B, _, HW = pooled.shape
    C = wstem_t.shape[0]
    thw = _pick_hw_tile(HW)
    nt = HW // thw
    out = jax.ShapeDtypeStruct((B, C, HW), jnp.bfloat16)
    return pl.pallas_call(
        functools.partial(_encoder_kernel, c=C),
        out_shape=(out, out),
        grid=(B, nt),
        in_specs=[
            pl.BlockSpec((1, 3, thw), lambda b, t: (b, 0, t)),
            pl.BlockSpec((1, C, 1), lambda b, t: (b, 0, 0)),
            pl.BlockSpec((C, 3), lambda b, t: (0, 0)),
            pl.BlockSpec((2 * C, C), lambda b, t: (0, 0)),
        ],
        out_specs=(
            pl.BlockSpec((1, C, thw), lambda b, t: (b, 0, t)),
            pl.BlockSpec((1, C, thw), lambda b, t: (b, 0, t)),
        ),
        compiler_params=_compiler_params(),
    )(pooled, bs_scale, wstem_t, wcd_t)


# ----------------------------------------------------------------------------
# Kernel 2: Topk similarity
#   The frequency-attention channel scale is folded into the anchor vector
#   in JAX, so the kernel is a single lane-dense channel reduction.
# ----------------------------------------------------------------------------
def _sim_kernel(cls_ref, a2_ref, sim_ref, *, inv_sqrt_c):
    x = cls_ref[0] * a2_ref[0]                 # bf16 * f32 -> f32, (C, thw)
    sim_ref[0] = jnp.sum(x, axis=0, keepdims=True) * inv_sqrt_c   # (1, thw)


def sim_apply(clsfea_t, anchor_scaled, inv_sqrt_c):
    B, C, HW = clsfea_t.shape
    thw = _pick_hw_tile(HW)
    nt = HW // thw
    return pl.pallas_call(
        functools.partial(_sim_kernel, inv_sqrt_c=inv_sqrt_c),
        out_shape=jax.ShapeDtypeStruct((B, 1, HW), jnp.float32),
        grid=(B, nt),
        in_specs=[
            pl.BlockSpec((1, C, thw), lambda b, t: (b, 0, t)),
            pl.BlockSpec((1, C, 1), lambda b, t: (b, 0, 0)),
        ],
        out_specs=pl.BlockSpec((1, 1, thw), lambda b, t: (b, 0, t)),
        compiler_params=_compiler_params(),
    )(clsfea_t, anchor_scaled)


# ----------------------------------------------------------------------------
# Kernel 3: fused MultiperceptionCounting(256) + GroupOp cross mask +
#           DensityRegressor.
#   The 256-wide hidden activation and clsfea1 never touch HBM; the mask is
#   computed in-register and multiplied straight into denfea.  Lane-dense
#   (1, thw) density output.
# ----------------------------------------------------------------------------
def _multi_mask_decoder_kernel(cls_ref, den_ref, fsc_ref, anc_ref,
                               wm1_t_ref, wm2_t_ref, wd1_t_ref, wd2_ref,
                               out_ref, *, inv_sqrt_c):
    # freq-scaled clsfea (scale fused in the prologue; scaled map never in HBM)
    x = cls_ref[0] * fsc_ref[0]                                   # (C, thw) f32
    xb = x.astype(jnp.bfloat16)
    h = jnp.maximum(jnp.dot(wm1_t_ref[...], xb,
                            preferred_element_type=jnp.float32), 0.0)   # (256, thw)
    y = jnp.maximum(jnp.dot(wm2_t_ref[...], h.astype(jnp.bfloat16),
                            preferred_element_type=jnp.float32), 0.0)   # (C, thw)
    # GroupOp: similarity of clsfea1 against the refined anchor, sigmoid mask
    sim = jnp.sum(y * anc_ref[0], axis=0, keepdims=True) * inv_sqrt_c   # (1, thw)
    mask = jax.nn.sigmoid(sim)                                          # in-register
    # DensityRegressor on the masked density features
    xd = (den_ref[0] * mask).astype(jnp.bfloat16)                       # (C, thw)
    hd = jnp.maximum(jnp.dot(wd1_t_ref[...], xd,
                             preferred_element_type=jnp.float32), 0.0)  # (C, thw)
    d = jnp.maximum(jnp.sum(wd2_ref[...] * hd, axis=0, keepdims=True), 0.0)
    out_ref[0] = d                                                      # (1, thw)


def multi_mask_decoder_apply(clsfea_t, denfea_t, fscale, anchor2,
                             wm1_t, wm2_t, wd1_t, wd2, inv_sqrt_c):
    B, C, HW = clsfea_t.shape
    HID = wm1_t.shape[0]
    thw = _pick_hw_tile(HW)
    nt = HW // thw
    return pl.pallas_call(
        functools.partial(_multi_mask_decoder_kernel, inv_sqrt_c=inv_sqrt_c),
        out_shape=jax.ShapeDtypeStruct((B, 1, HW), jnp.float32),
        grid=(B, nt),
        in_specs=[
            pl.BlockSpec((1, C, thw), lambda b, t: (b, 0, t)),
            pl.BlockSpec((1, C, thw), lambda b, t: (b, 0, t)),
            pl.BlockSpec((1, C, 1), lambda b, t: (b, 0, 0)),
            pl.BlockSpec((1, C, 1), lambda b, t: (b, 0, 0)),
            pl.BlockSpec((HID, C), lambda b, t: (0, 0)),
            pl.BlockSpec((C, HID), lambda b, t: (0, 0)),
            pl.BlockSpec((C, C), lambda b, t: (0, 0)),
            pl.BlockSpec((C, 1), lambda b, t: (0, 0)),
        ],
        out_specs=pl.BlockSpec((1, 1, thw), lambda b, t: (b, 0, t)),
        compiler_params=_compiler_params(),
    )(clsfea_t, denfea_t, fscale, anchor2, wm1_t, wm2_t, wd1_t, wd2)


# ----------------------------------------------------------------------------
# Plain-JAX glue (DCT filters, ROIAlign gather, top-k, tiny MLPs)
# ----------------------------------------------------------------------------
def build_dct_filter(C, h, w):
    """Top-2 DCT frequency filters (FcaNet 'top2'), split across channels."""
    freqs = [(0, 0), (0, 1)]
    filt = np.zeros((C, h, w), np.float32)
    per = C // len(freqs)
    for i, (u, v) in enumerate(freqs):
        xs = np.arange(h)[:, None]
        ys = np.arange(w)[None, :]
        val = np.cos(np.pi * (xs + 0.5) * u / h) * np.cos(np.pi * (ys + 0.5) * v / w)
        filt[i * per:(i + 1) * per] = val
    return jnp.asarray(filt.reshape(C, h * w))


def roi_align_nchw(fea_nchw, boxes, out_size, spatial_scale):
    """Bilinear ROIAlign on NCHW features. boxes: (N,5)=[batch_idx,x1,y1,x2,y2]."""
    # TODO(synk): data-dependent gather kept in plain JAX; a Pallas version would
    # need manual DMA gather (memory_space=pl.ANY + make_async_copy).
    B, C, H, W = fea_nchw.shape

    def one(box):
        bidx = box[0].astype(jnp.int32)
        x1, y1, x2, y2 = (box[1] * spatial_scale, box[2] * spatial_scale,
                          box[3] * spatial_scale, box[4] * spatial_scale)
        ys = y1 + (jnp.arange(out_size, dtype=jnp.float32) + 0.5) * (y2 - y1) / out_size
        xs = x1 + (jnp.arange(out_size, dtype=jnp.float32) + 0.5) * (x2 - x1) / out_size
        yy, xx = jnp.meshgrid(ys, xs, indexing="ij")
        py, px = yy - 0.5, xx - 0.5
        y0, x0 = jnp.floor(py), jnp.floor(px)
        wy, wx = py - y0, px - x0
        y0i = jnp.clip(y0, 0, H - 1).astype(jnp.int32)
        y1i = jnp.clip(y0 + 1, 0, H - 1).astype(jnp.int32)
        x0i = jnp.clip(x0, 0, W - 1).astype(jnp.int32)
        x1i = jnp.clip(x0 + 1, 0, W - 1).astype(jnp.int32)
        img = fea_nchw[bidx]                               # (C, H, W)
        v00, v01 = img[:, y0i, x0i], img[:, y0i, x1i]      # (C, o, o)
        v10, v11 = img[:, y1i, x0i], img[:, y1i, x1i]
        return (v00 * (1 - wy) * (1 - wx) + v01 * (1 - wy) * wx
                + v10 * wy * (1 - wx) + v11 * wy * wx)

    return jax.vmap(one)(boxes)                            # (N, C, out, out)


def init_params(key, feadim=32, multi_hidden=256):
    ks = jax.random.split(key, 12)
    g = lambda k, shape: (0.1 * jax.random.normal(k, shape)).astype(jnp.float32)
    cr = max(feadim // 16, 4)
    return {
        "w_stem": g(ks[0], (3, feadim)),           # encoder stem (on pooled image)
        "w_bs": g(ks[1], (2, feadim)),             # box-size FiLM modulation
        "w_cls": g(ks[2], (feadim, feadim)),       # encoder cls branch
        "w_den": g(ks[3], (feadim, feadim)),       # encoder den branch
        "w_f1": g(ks[4], (feadim, cr)),            # freq-attention squeeze
        "w_f2": g(ks[5], (cr, feadim)),            # freq-attention excite
        "w_m1": g(ks[6], (feadim, multi_hidden)),  # MultiperceptionCounting(256)
        "w_m2": g(ks[7], (multi_hidden, feadim)),
        "w_d1": g(ks[8], (feadim, feadim)),        # DensityRegressor
        "w_d2": g(ks[9], (feadim, 1)),
        # self.linear is defined in __init__ but never used in forward() -> omitted.
        "dct": build_dct_filter(feadim, 14, 14),   # (C, 196)
    }


def ffmc_forward(params, image_nchw, boxes, roi=16, topk=10):
    B, _, IMH, IMW = image_nchw.shape
    C = params["w_stem"].shape[1]
    Hf, Wf = IMH // 8, IMW // 8
    HW = Hf * Wf
    inv_sqrt_c = 1.0 / math.sqrt(C)

    # Channel-major kernels compute W^T @ X: pre-transpose / concatenate weights,
    # cast matmul weights to bf16 (f32 accumulation inside the kernels).
    wstem_t = params["w_stem"].T                                                # (C, 3)
    wcd_t = jnp.concatenate([params["w_cls"], params["w_den"]], axis=1).T
    wcd_t = wcd_t.astype(jnp.bfloat16)                                          # (2C, C)
    wm1_t = params["w_m1"].T.astype(jnp.bfloat16)                               # (256, C)
    wm2_t = params["w_m2"].T.astype(jnp.bfloat16)                               # (C, 256)
    wd1_t = params["w_d1"].T.astype(jnp.bfloat16)                               # (C, C)
    wd2 = params["w_d2"]                                                        # (C, 1)

    # ---- box statistics (matches torch.stack((b[:,4]-b[:,2], b[:,3]-b[:,1]),-1))
    bsize = jnp.stack((boxes[:, 4] - boxes[:, 2], boxes[:, 3] - boxes[:, 1]), axis=-1)
    bs_mean = bsize.reshape(-1, 3, 2).astype(jnp.float32).mean(axis=1)          # (B, 2)

    # ---- encoder (Vgg19 stand-in): /8 avg-pool, then fused Pallas kernel
    # TODO(synk): /8 pooling of the raw image stays in XLA (the image read
    # dominates and happens exactly once either way).
    pooled = image_nchw.astype(jnp.float32).reshape(B, 3, Hf, 8, Wf, 8).mean(axis=(3, 5))
    pooled = pooled.reshape(B, 3, HW)                                           # (B,3,HW)
    bs_scale = jax.nn.sigmoid(bs_mean @ params["w_bs"]).reshape(B, C, 1)        # (B,C,1)
    clsfea_t, denfea_t = encoder_apply(pooled, bs_scale, wstem_t, wcd_t)        # bf16

    # ---- freq1: FcaNet-style frequency channel attention (plain JAX: tiny work).
    # The resulting channel scale is NEVER applied to the feature map in HBM: it
    # is folded into the ROI anchor (ROIAlign is linear) and into the prologue of
    # the fused multi/mask/decoder kernel.
    cls_nchw = clsfea_t.astype(jnp.float32).reshape(B, C, Hf, Wf)
    pooled14 = jax.image.resize(cls_nchw, (B, C, 14, 14), method="linear")
    spec = jnp.sum(pooled14.reshape(B, C, 196) * params["dct"][None], axis=-1)  # (B, C)
    fscale = jax.nn.sigmoid(jnp.maximum(spec @ params["w_f1"], 0.0) @ params["w_f2"])

    # ---- ROIAlign on 3 exemplar boxes per image -> anchor class vector
    patches = roi_align_nchw(cls_nchw, boxes, roi, 1.0 / 8)                     # (3B,C,r,r)
    anchor_cls = patches.reshape(B, 3, C, roi, roi).mean(axis=1).mean(axis=(-1, -2))
    anchor_cls = anchor_cls * fscale          # == ROIAlign(freq-scaled clsfea) (B, C)

    # ---- Topk similarity (Pallas, lane-dense) + top-k refinement (plain JAX).
    # fscale folded into the anchor: sum_c cls*fscale*anchor == sum_c cls*(fscale*anchor)
    sim = sim_apply(clsfea_t, (anchor_cls * fscale).reshape(B, C, 1), inv_sqrt_c)
    sim = sim.reshape(B, HW)
    _, topi = lax.top_k(sim, topk)                                              # glue
    gathered = jnp.take_along_axis(clsfea_t, topi[:, None, :], axis=2)          # (B,C,k)
    gathered = gathered.astype(jnp.float32) * fscale[:, :, None]                # freq-scaled
    anchor_cls2 = 0.5 * anchor_cls + 0.5 * gathered.mean(axis=2)                # (B, C)
    # TODO(synk): real Topk also consumes denfea/bs_mean; exact use unknown.

    # ---- Multi-perception MLP + GroupOp cross mask + DensityRegressor (fused;
    # clsfea1, the 256-wide hidden and the mask never touch HBM)
    den = multi_mask_decoder_apply(clsfea_t, denfea_t, fscale.reshape(B, C, 1),
                                   anchor_cls2.reshape(B, C, 1),
                                   wm1_t, wm2_t, wd1_t, wd2, inv_sqrt_c)        # (B,1,HW)
    # TODO(synk): real DensityRegressor likely upsamples; density returned at /8.
    return den.reshape(B, 1, Hf, Wf)                                            # NCHW


if __name__ == "__main__":
    key = jax.random.PRNGKey(0)
    k_img, k_par = jax.random.split(key)

    B, IMH, IMW, FEADIM = 2, 128, 128, 32
    image = jax.random.normal(k_img, (B, 3, IMH, IMW), dtype=jnp.float32)
    # boxes: [batch_idx, x1, y1, x2, y2], 3 exemplar boxes per image
    boxes = jnp.array(
        [
            [0, 8.0, 12.0, 40.0, 52.0],
            [0, 20.0, 16.0, 60.0, 48.0],
            [0, 64.0, 60.0, 104.0, 100.0],
            [1, 4.0, 4.0, 36.0, 36.0],
            [1, 40.0, 20.0, 88.0, 68.0],
            [1, 80.0, 72.0, 120.0, 120.0],
        ],
        dtype=jnp.float32,
    )

    params = init_params(k_par, feadim=FEADIM)
    denmap = jax.jit(ffmc_forward)(params, image, boxes)
    jax.block_until_ready(denmap)
    assert denmap.shape == (B, 1, IMH // 8, IMW // 8)
    print("KERNEL_OK")
</pallas_src>

<mosaic_0001>
module attributes {stable_mosaic.version = 11 : i64} {
  func.func @_encoder_kernel(%arg0: i32, %arg1: i32, %arg2: memref<1x3x256xf32, #tpu.memory_space<vmem>>, %arg3: memref<1x32x1xf32, #tpu.memory_space<vmem>>, %arg4: memref<32x3xf32, #tpu.memory_space<vmem>>, %arg5: memref<64x32xbf16, #tpu.memory_space<vmem>>, %arg6: memref<1x32x256xbf16, #tpu.memory_space<vmem>>, %arg7: memref<1x32x256xbf16, #tpu.memory_space<vmem>>) attributes {dimension_semantics = [#tpu.dimension_semantics<parallel>, #tpu.dimension_semantics<parallel>], iteration_bounds = array<i64: 2, 1>, scalar_prefetch = 0 : i64, scratch_operands = 0 : i64, tpu.core_type = #tpu.core_type<tc>, window_params = [{transform_indices = @transform_0, window_bounds = array<i64: 1, 3, 256>}, {transform_indices = @transform_1, window_bounds = array<i64: 1, 32, 1>}, {pipeline_mode = #tpu.pipeline_mode<synchronous>, transform_indices = @transform_2, window_bounds = array<i64: 32, 3>}, {pipeline_mode = #tpu.pipeline_mode<synchronous>, transform_indices = @transform_3, window_bounds = array<i64: 64, 32>}, {transform_indices = @transform_4, window_bounds = array<i64: 1, 32, 256>}, {transform_indices = @transform_5, window_bounds = array<i64: 1, 32, 256>}]} {
    %c0 = arith.constant 0 : index
    %c0_0 = arith.constant 0 : index
    %c0_1 = arith.constant 0 : index
    %0 = vector.load %arg2[%c0, %c0_0, %c0_1] : memref<1x3x256xf32, #tpu.memory_space<vmem>>, vector<1x3x256xf32>
    %1 = vector.shape_cast %0 : vector<1x3x256xf32> to vector<3x256xf32>
    %c0_2 = arith.constant 0 : index
    %c0_3 = arith.constant 0 : index
    %2 = vector.load %arg4[%c0_2, %c0_3] : memref<32x3xf32, #tpu.memory_space<vmem>>, vector<32x3xf32>
    %3 = vector.extract_strided_slice %2 {offsets = [0, 0], sizes = [32, 1], strides = [1, 1]} : vector<32x3xf32> to vector<32x1xf32>
    %4 = vector.extract_strided_slice %1 {offsets = [0, 0], sizes = [1, 256], strides = [1, 1]} : vector<3x256xf32> to vector<1x256xf32>
    %5 = vector.broadcast %3 : vector<32x1xf32> to vector<32x256xf32>
    %6 = vector.broadcast %4 : vector<1x256xf32> to vector<32x256xf32>
    %7 = arith.mulf %5, %6 : vector<32x256xf32>
    %8 = vector.extract_strided_slice %2 {offsets = [0, 1], sizes = [32, 1], strides = [1, 1]} : vector<32x3xf32> to vector<32x1xf32>
    %9 = vector.extract_strided_slice %1 {offsets = [1, 0], sizes = [1, 256], strides = [1, 1]} : vector<3x256xf32> to vector<1x256xf32>
    %10 = vector.broadcast %8 : vector<32x1xf32> to vector<32x256xf32>
    %11 = vector.broadcast %9 : vector<1x256xf32> to vector<32x256xf32>
    %12 = arith.mulf %10, %11 : vector<32x256xf32>
    %13 = arith.addf %7, %12 : vector<32x256xf32>
    %14 = vector.extract_strided_slice %2 {offsets = [0, 2], sizes = [32, 1], strides = [1, 1]} : vector<32x3xf32> to vector<32x1xf32>
    %15 = vector.extract_strided_slice %1 {offsets = [2, 0], sizes = [1, 256], strides = [1, 1]} : vector<3x256xf32> to vector<1x256xf32>
    %16 = vector.broadcast %14 : vector<32x1xf32> to vector<32x256xf32>
    %17 = vector.broadcast %15 : vector<1x256xf32> to vector<32x256xf32>
    %18 = arith.mulf %16, %17 : vector<32x256xf32>
    %19 = arith.addf %13, %18 : vector<32x256xf32>
    %cst = arith.constant 0.000000e+00 : f32
    %20 = vector.broadcast %cst : f32 to vector<32x256xf32>
    %21 = arith.maximumf %19, %20 : vector<32x256xf32>
    %c0_4 = arith.constant 0 : index
    %c0_5 = arith.constant 0 : index
    %c0_6 = arith.constant 0 : index
    %22 = vector.load %arg3[%c0_4, %c0_5, %c0_6] : memref<1x32x1xf32, #tpu.memory_space<vmem>>, vector<1x32x1xf32>
    %23 = vector.shape_cast %22 : vector<1x32x1xf32> to vector<32x1xf32>
    %24 = vector.broadcast %23 : vector<32x1xf32> to vector<32x256xf32>
    %25 = arith.mulf %21, %24 : vector<32x256xf32>
    %c0_7 = arith.constant 0 : index
    %c0_8 = arith.constant 0 : index
    %26 = vector.load %arg5[%c0_7, %c0_8] : memref<64x32xbf16, #tpu.memory_space<vmem>>, vector<64x32xbf16>
    %27 = arith.truncf %25 : vector<32x256xf32> to vector<32x256xbf16>
    %cst_9 = arith.constant dense<0.000000e+00> : vector<64x256xf32>
    %28 = tpu.matmul %26, %27, %cst_9 {dimension_numbers = #tpu.dot_dimension_numbers<[1], [0], [0], [1], [0, 0, 1, 1], [], []>} : vector<64x32xbf16>, vector<32x256xbf16>, vector<64x256xf32> -> vector<64x256xf32>
    %cst_10 = arith.constant 0.000000e+00 : f32
    %29 = vector.broadcast %cst_10 : f32 to vector<64x256xf32>
    %30 = arith.maximumf %28, %29 : vector<64x256xf32>
    %31 = vector.extract_strided_slice %30 {offsets = [0, 0], sizes = [32, 256], strides = [1, 1]} : vector<64x256xf32> to vector<32x256xf32>
    %32 = arith.truncf %31 : vector<32x256xf32> to vector<32x256xbf16>
    %c0_11 = arith.constant 0 : index
    %c0_12 = arith.constant 0 : index
    %c0_13 = arith.constant 0 : index
    %33 = vector.load %arg6[%c0_11, %c0_12, %c0_13] : memref<1x32x256xbf16, #tpu.memory_space<vmem>>, vector<1x32x256xbf16>
    %34 = vector.shape_cast %33 : vector<1x32x256xbf16> to vector<32x256xbf16>
    %35 = vector.shape_cast %32 : vector<32x256xbf16> to vector<1x32x256xbf16>
    tpu.vector_store %arg6[%c0_11, %c0_12, %c0_13], %35 {strides = array<i32>} : memref<1x32x256xbf16, #tpu.memory_space<vmem>>, vector<1x32x256xbf16>,
    %36 = vector.extract_strided_slice %30 {offsets = [32, 0], sizes = [32, 256], strides = [1, 1]} : vector<64x256xf32> to vector<32x256xf32>
    %37 = arith.truncf %36 : vector<32x256xf32> to vector<32x256xbf16>
    %c0_14 = arith.constant 0 : index
    %c0_15 = arith.constant 0 : index
    %c0_16 = arith.constant 0 : index
    %38 = vector.load %arg7[%c0_14, %c0_15, %c0_16] : memref<1x32x256xbf16, #tpu.memory_space<vmem>>, vector<1x32x256xbf16>
    %39 = vector.shape_cast %38 : vector<1x32x256xbf16> to vector<32x256xbf16>
    %40 = vector.shape_cast %37 : vector<32x256xbf16> to vector<1x32x256xbf16>
    tpu.vector_store %arg7[%c0_14, %c0_15, %c0_16], %40 {strides = array<i32>} : memref<1x32x256xbf16, #tpu.memory_space<vmem>>, vector<1x32x256xbf16>,
    return
  }
  func.func @transform_0(%arg0: i32, %arg1: i32) -> (i32, i32, i32) {
    %c0_i32 = arith.constant 0 : i32
    %c0_i32_0 = arith.constant 0 : i32
    return %arg0, %c0_i32, %arg1 : i32, i32, i32
  }
  func.func @transform_1(%arg0: i32, %arg1: i32) -> (i32, i32, i32) {
    %c0_i32 = arith.constant 0 : i32
    %c0_i32_0 = arith.constant 0 : i32
    %c0_i32_1 = arith.constant 0 : i32
    return %arg0, %c0_i32, %c0_i32_0 : i32, i32, i32
  }
  func.func @transform_2(%arg0: i32, %arg1: i32) -> (i32, i32) {
    %c0_i32 = arith.constant 0 : i32
    %c0_i32_0 = arith.constant 0 : i32
    %c0_i32_1 = arith.constant 0 : i32
    return %c0_i32, %c0_i32_0 : i32, i32
  }
  func.func @transform_3(%arg0: i32, %arg1: i32) -> (i32, i32) {
    %c0_i32 = arith.constant 0 : i32
    %c0_i32_0 = arith.constant 0 : i32
    %c0_i32_1 = arith.constant 0 : i32
    return %c0_i32, %c0_i32_0 : i32, i32
  }
  func.func @transform_4(%arg0: i32, %arg1: i32) -> (i32, i32, i32) {
    %c0_i32 = arith.constant 0 : i32
    %c0_i32_0 = arith.constant 0 : i32
    return %arg0, %c0_i32, %arg1 : i32, i32, i32
  }
  func.func @transform_5(%arg0: i32, %arg1: i32) -> (i32, i32, i32) {
    %c0_i32 = arith.constant 0 : i32
    %c0_i32_0 = arith.constant 0 : i32
    return %arg0, %c0_i32, %arg1 : i32, i32, i32
  }
}

module attributes {stable_mosaic.version = 11 : i64} {
  func.func @_sim_kernel(%arg0: i32, %arg1: i32, %arg2: memref<1x32x256xbf16, #tpu.memory_space<vmem>>, %arg3: memref<1x32x1xf32, #tpu.memory_space<vmem>>, %arg4: memref<1x1x256xf32, #tpu.memory_space<vmem>>) attributes {dimension_semantics = [#tpu.dimension_semantics<parallel>, #tpu.dimension_semantics<parallel>], iteration_bounds = array<i64: 2, 1>, scalar_prefetch = 0 : i64, scratch_operands = 0 : i64, tpu.core_type = #tpu.core_type<tc>, window_params = [{transform_indices = @transform_0, window_bounds = array<i64: 1, 32, 256>}, {transform_indices = @transform_1, window_bounds = array<i64: 1, 32, 1>}, {transform_indices = @transform_2, window_bounds = array<i64: 1, 1, 256>}]} {
    %c0 = arith.constant 0 : index
    %c0_0 = arith.constant 0 : index
    %c0_1 = arith.constant 0 : index
    %0 = vector.load %arg2[%c0, %c0_0, %c0_1] : memref<1x32x256xbf16, #tpu.memory_space<vmem>>, vector<1x32x256xbf16>
    %1 = vector.shape_cast %0 : vector<1x32x256xbf16> to vector<32x256xbf16>
    %c0_2 = arith.constant 0 : index
    %c0_3 = arith.constant 0 : index
    %c0_4 = arith.constant 0 : index
    %2 = vector.load %arg3[%c0_2, %c0_3, %c0_4] : memref<1x32x1xf32, #tpu.memory_space<vmem>>, vector<1x32x1xf32>
    %3 = vector.shape_cast %2 : vector<1x32x1xf32> to vector<32x1xf32>
    %4 = arith.extf %1 : vector<32x256xbf16> to vector<32x256xf32>
    %5 = vector.broadcast %3 : vector<32x1xf32> to vector<32x256xf32>
    %6 = arith.mulf %4, %5 : vector<32x256xf32>
    %cst = arith.constant dense<0.000000e+00> : vector<256xf32>
    %7 = vector.multi_reduction <add>, %6, %cst [0] : vector<32x256xf32> to vector<256xf32>
    %8 = vector.shape_cast %7 : vector<256xf32> to vector<1x256xf32>
    %cst_5 = arith.constant 0.176776692 : f32
    %9 = vector.broadcast %cst_5 : f32 to vector<1x256xf32>
    %10 = arith.mulf %8, %9 : vector<1x256xf32>
    %c0_6 = arith.constant 0 : index
    %c0_7 = arith.constant 0 : index
    %c0_8 = arith.constant 0 : index
    %11 = vector.load %arg4[%c0_6, %c0_7, %c0_8] : memref<1x1x256xf32, #tpu.memory_space<vmem>>, vector<1x1x256xf32>
    %12 = vector.shape_cast %11 : vector<1x1x256xf32> to vector<1x256xf32>
    %13 = vector.shape_cast %10 : vector<1x256xf32> to vector<1x1x256xf32>
    tpu.vector_store %arg4[%c0_6, %c0_7, %c0_8], %13 {strides = array<i32>} : memref<1x1x256xf32, #tpu.memory_space<vmem>>, vector<1x1x256xf32>,
    return
  }
  func.func @transform_0(%arg0: i32, %arg1: i32) -> (i32, i32, i32) {
    %c0_i32 = arith.constant 0 : i32
    %c0_i32_0 = arith.constant 0 : i32
    return %arg0, %c0_i32, %arg1 : i32, i32, i32
  }
  func.func @transform_1(%arg0: i32, %arg1: i32) -> (i32, i32, i32) {
    %c0_i32 = arith.constant 0 : i32
    %c0_i32_0 = arith.constant 0 : i32
    %c0_i32_1 = arith.constant 0 : i32
    return %arg0, %c0_i32, %c0_i32_0 : i32, i32, i32
  }
  func.func @transform_2(%arg0: i32, %arg1: i32) -> (i32, i32, i32) {
    %c0_i32 = arith.constant 0 : i32
    %c0_i32_0 = arith.constant 0 : i32
    return %arg0, %c0_i32, %arg1 : i32, i32, i32
  }
}

module attributes {stable_mosaic.version = 11 : i64} {
  func.func @_multi_mask_decoder_kernel(%arg0: i32, %arg1: i32, %arg2: memref<1x32x256xbf16, #tpu.memory_space<vmem>>, %arg3: memref<1x32x256xbf16, #tpu.memory_space<vmem>>, %arg4: memref<1x32x1xf32, #tpu.memory_space<vmem>>, %arg5: memref<1x32x1xf32, #tpu.memory_space<vmem>>, %arg6: memref<256x32xbf16, #tpu.memory_space<vmem>>, %arg7: memref<32x256xbf16, #tpu.memory_space<vmem>>, %arg8: memref<32x32xbf16, #tpu.memory_space<vmem>>, %arg9: memref<32x1xf32, #tpu.memory_space<vmem>>, %arg10: memref<1x1x256xf32, #tpu.memory_space<vmem>>) attributes {dimension_semantics = [#tpu.dimension_semantics<parallel>, #tpu.dimension_semantics<parallel>], iteration_bounds = array<i64: 2, 1>, scalar_prefetch = 0 : i64, scratch_operands = 0 : i64, tpu.core_type = #tpu.core_type<tc>, window_params = [{transform_indices = @transform_0, window_bounds = array<i64: 1, 32, 256>}, {transform_indices = @transform_1, window_bounds = array<i64: 1, 32, 256>}, {transform_indices = @transform_2, window_bounds = array<i64: 1, 32, 1>}, {transform_indices = @transform_3, window_bounds = array<i64: 1, 32, 1>}, {pipeline_mode = #tpu.pipeline_mode<synchronous>, transform_indices = @transform_4, window_bounds = array<i64: 256, 32>}, {pipeline_mode = #tpu.pipeline_mode<synchronous>, transform_indices = @transform_5, window_bounds = array<i64: 32, 256>}, {pipeline_mode = #tpu.pipeline_mode<synchronous>, transform_indices = @transform_6, window_bounds = array<i64: 32, 32>}, {pipeline_mode = #tpu.pipeline_mode<synchronous>, transform_indices = @transform_7, window_bounds = array<i64: 32, 1>}, {transform_indices = @transform_8, window_bounds = array<i64: 1, 1, 256>}]} {
    %c0 = arith.constant 0 : index
    %c0_0 = arith.constant 0 : index
    %c0_1 = arith.constant 0 : index
    %0 = vector.load %arg2[%c0, %c0_0, %c0_1] : memref<1x32x256xbf16, #tpu.memory_space<vmem>>, vector<1x32x256xbf16>
    %1 = vector.shape_cast %0 : vector<1x32x256xbf16> to vector<32x256xbf16>
    %c0_2 = arith.constant 0 : index
    %c0_3 = arith.constant 0 : index
    %c0_4 = arith.constant 0 : index
    %2 = vector.load %arg4[%c0_2, %c0_3, %c0_4] : memref<1x32x1xf32, #tpu.memory_space<vmem>>, vector<1x32x1xf32>
    %3 = vector.shape_cast %2 : vector<1x32x1xf32> to vector<32x1xf32>
    %4 = arith.extf %1 : vector<32x256xbf16> to vector<32x256xf32>
    %5 = vector.broadcast %3 : vector<32x1xf32> to vector<32x256xf32>
    %6 = arith.mulf %4, %5 : vector<32x256xf32>
    %7 = arith.truncf %6 : vector<32x256xf32> to vector<32x256xbf16>
    %c0_5 = arith.constant 0 : index
    %c0_6 = arith.constant 0 : index
    %8 = vector.load %arg6[%c0_5, %c0_6] : memref<256x32xbf16, #tpu.memory_space<vmem>>, vector<256x32xbf16>
    %cst = arith.constant dense<0.000000e+00> : vector<256x256xf32>
    %9 = tpu.matmul %8, %7, %cst {dimension_numbers = #tpu.dot_dimension_numbers<[1], [0], [0], [1], [0, 0, 1, 1], [], []>} : vector<256x32xbf16>, vector<32x256xbf16>, vector<256x256xf32> -> vector<256x256xf32>
    %cst_7 = arith.constant 0.000000e+00 : f32
    %10 = vector.broadcast %cst_7 : f32 to vector<256x256xf32>
    %11 = arith.maximumf %9, %10 : vector<256x256xf32>
    %c0_8 = arith.constant 0 : index
    %c0_9 = arith.constant 0 : index
    %12 = vector.load %arg7[%c0_8, %c0_9] : memref<32x256xbf16, #tpu.memory_space<vmem>>, vector<32x256xbf16>
    %13 = arith.truncf %11 : vector<256x256xf32> to vector<256x256xbf16>
    %cst_10 = arith.constant dense<0.000000e+00> : vector<32x256xf32>
    %14 = tpu.matmul %12, %13, %cst_10 {dimension_numbers = #tpu.dot_dimension_numbers<[1], [0], [0], [1], [0, 0, 1, 1], [], []>} : vector<32x256xbf16>, vector<256x256xbf16>, vector<32x256xf32> -> vector<32x256xf32>
    %cst_11 = arith.constant 0.000000e+00 : f32
    %15 = vector.broadcast %cst_11 : f32 to vector<32x256xf32>
    %16 = arith.maximumf %14, %15 : vector<32x256xf32>
    %c0_12 = arith.constant 0 : index
    %c0_13 = arith.constant 0 : index
    %c0_14 = arith.constant 0 : index
    %17 = vector.load %arg5[%c0_12, %c0_13, %c0_14] : memref<1x32x1xf32, #tpu.memory_space<vmem>>, vector<1x32x1xf32>
    %18 = vector.shape_cast %17 : vector<1x32x1xf32> to vector<32x1xf32>
    %19 = vector.broadcast %18 : vector<32x1xf32> to vector<32x256xf32>
    %20 = arith.mulf %16, %19 : vector<32x256xf32>
    %cst_15 = arith.constant dense<0.000000e+00> : vector<256xf32>
    %21 = vector.multi_reduction <add>, %20, %cst_15 [0] : vector<32x256xf32> to vector<256xf32>
    %22 = vector.shape_cast %21 : vector<256xf32> to vector<1x256xf32>
    %cst_16 = arith.constant 0.176776692 : f32
    %23 = vector.broadcast %cst_16 : f32 to vector<1x256xf32>
    %24 = arith.mulf %22, %23 : vector<1x256xf32>
    %25 = arith.negf %24 : vector<1x256xf32>
    %26 = math.exp %25 : vector<1x256xf32>
    %cst_17 = arith.constant 1.000000e+00 : f32
    %27 = vector.broadcast %cst_17 : f32 to vector<1x256xf32>
    %28 = arith.addf %27, %26 : vector<1x256xf32>
    %29 = arith.divf %27, %28 : vector<1x256xf32>
    %c0_18 = arith.constant 0 : index
    %c0_19 = arith.constant 0 : index
    %c0_20 = arith.constant 0 : index
    %30 = vector.load %arg3[%c0_18, %c0_19, %c0_20] : memref<1x32x256xbf16, #tpu.memory_space<vmem>>, vector<1x32x256xbf16>
    %31 = vector.shape_cast %30 : vector<1x32x256xbf16> to vector<32x256xbf16>
    %32 = arith.extf %31 : vector<32x256xbf16> to vector<32x256xf32>
    %33 = vector.broadcast %29 : vector<1x256xf32> to vector<32x256xf32>
    %34 = arith.mulf %32, %33 : vector<32x256xf32>
    %35 = arith.truncf %34 : vector<32x256xf32> to vector<32x256xbf16>
    %c0_21 = arith.constant 0 : index
    %c0_22 = arith.constant 0 : index
    %36 = vector.load %arg8[%c0_21, %c0_22] : memref<32x32xbf16, #tpu.memory_space<vmem>>, vector<32x32xbf16>
    %cst_23 = arith.constant dense<0.000000e+00> : vector<32x256xf32>
    %37 = tpu.matmul %36, %35, %cst_23 {dimension_numbers = #tpu.dot_dimension_numbers<[1], [0], [0], [1], [0, 0, 1, 1], [], []>} : vector<32x32xbf16>, vector<32x256xbf16>, vector<32x256xf32> -> vector<32x256xf32>
    %cst_24 = arith.constant 0.000000e+00 : f32
    %38 = vector.broadcast %cst_24 : f32 to vector<32x256xf32>
    %39 = arith.maximumf %37, %38 : vector<32x256xf32>
    %c0_25 = arith.constant 0 : index
    %c0_26 = arith.constant 0 : index
    %40 = vector.load %arg9[%c0_25, %c0_26] : memref<32x1xf32, #tpu.memory_space<vmem>>, vector<32x1xf32>
    %41 = vector.broadcast %40 : vector<32x1xf32> to vector<32x256xf32>
    %42 = arith.mulf %41, %39 : vector<32x256xf32>
    %cst_27 = arith.constant dense<0.000000e+00> : vector<256xf32>
    %43 = vector.multi_reduction <add>, %42, %cst_27 [0] : vector<32x256xf32> to vector<256xf32>
    %44 = vector.shape_cast %43 : vector<256xf32> to vector<1x256xf32>
    %cst_28 = arith.constant 0.000000e+00 : f32
    %45 = vector.broadcast %cst_28 : f32 to vector<1x256xf32>
    %46 = arith.maximumf %44, %45 : vector<1x256xf32>
    %c0_29 = arith.constant 0 : index
    %c0_30 = arith.constant 0 : index
    %c0_31 = arith.constant 0 : index
    %47 = vector.load %arg10[%c0_29, %c0_30, %c0_31] : memref<1x1x256xf32, #tpu.memory_space<vmem>>, vector<1x1x256xf32>
    %48 = vector.shape_cast %47 : vector<1x1x256xf32> to vector<1x256xf32>
    %49 = vector.shape_cast %46 : vector<1x256xf32> to vector<1x1x256xf32>
    tpu.vector_store %arg10[%c0_29, %c0_30, %c0_31], %49 {strides = array<i32>} : memref<1x1x256xf32, #tpu.memory_space<vmem>>, vector<1x1x256xf32>,
    return
  }
  func.func @transform_0(%arg0: i32, %arg1: i32) -> (i32, i32, i32) {
    %c0_i32 = arith.constant 0 : i32
    %c0_i32_0 = arith.constant 0 : i32
    return %arg0, %c0_i32, %arg1 : i32, i32, i32
  }
  func.func @transform_1(%arg0: i32, %arg1: i32) -> (i32, i32, i32) {
    %c0_i32 = arith.constant 0 : i32
    %c0_i32_0 = arith.constant 0 : i32
    return %arg0, %c0_i32, %arg1 : i32, i32, i32
  }
  func.func @transform_2(%arg0: i32, %arg1: i32) -> (i32, i32, i32) {
    %c0_i32 = arith.constant 0 : i32
    %c0_i32_0 = arith.constant 0 : i32
    %c0_i32_1 = arith.constant 0 : i32
    return %arg0, %c0_i32, %c0_i32_0 : i32, i32, i32
  }
  func.func @transform_3(%arg0: i32, %arg1: i32) -> (i32, i32, i32) {
    %c0_i32 = arith.constant 0 : i32
    %c0_i32_0 = arith.constant 0 : i32
    %c0_i32_1 = arith.constant 0 : i32
    return %arg0, %c0_i32, %c0_i32_0 : i32, i32, i32
  }
  func.func @transform_4(%arg0: i32, %arg1: i32) -> (i32, i32) {
    %c0_i32 = arith.constant 0 : i32
    %c0_i32_0 = arith.constant 0 : i32
    %c0_i32_1 = arith.constant 0 : i32
    return %c0_i32, %c0_i32_0 : i32, i32
  }
  func.func @transform_5(%arg0: i32, %arg1: i32) -> (i32, i32) {
    %c0_i32 = arith.constant 0 : i32
    %c0_i32_0 = arith.constant 0 : i32
    %c0_i32_1 = arith.constant 0 : i32
    return %c0_i32, %c0_i32_0 : i32, i32
  }
  func.func @transform_6(%arg0: i32, %arg1: i32) -> (i32, i32) {
    %c0_i32 = arith.constant 0 : i32
    %c0_i32_0 = arith.constant 0 : i32
    %c0_i32_1 = arith.constant 0 : i32
    return %c0_i32, %c0_i32_0 : i32, i32
  }
  func.func @transform_7(%arg0: i32, %arg1: i32) -> (i32, i32) {
    %c0_i32 = arith.constant 0 : i32
    %c0_i32_0 = arith.constant 0 : i32
    %c0_i32_1 = arith.constant 0 : i32
    return %c0_i32, %c0_i32_0 : i32, i32
  }
  func.func @transform_8(%arg0: i32, %arg1: i32) -> (i32, i32, i32) {
    %c0_i32 = arith.constant 0 : i32
    %c0_i32_0 = arith.constant 0 : i32
    return %arg0, %c0_i32, %arg1 : i32, i32, i32
  }
}

</mosaic_0001>

<bundles_post_ra>
// kernel: ffmc_forward.3
= control target key start
LH: loop header
LB: loop body
LE: loop exit
PB: predicated region body
PF: predicated region fallthrough
CT: control target
= control target key end

     0   :  { %s894_s18 = smov 0   ;;  %s896_s19 = smov 0   ;;  %s978_s0 = inlined_call_operand.vmem [shape: f32[2,3,256], index: 0, kind: input, shape index: {}]   ;;  %s979_s1 = inlined_call_operand.vmem [shape: f32[2,32,1], index: 1, kind: input, shape index: {}]   ;;  %s980_s2 = inlined_call_operand.vmem [shape: f32[32,3], index: 2, kind: input, shape index: {}]   ;;  %s981_s3 = inlined_call_operand.vmem [shape: bf16[64,32], index: 3, kind: input, shape index: {}]   ;;  %s982_s4 = inlined_call_operand.vmem [shape: bf16[2,32,256], index: 4, kind: output, shape index: {0}]   ;;  %s983_s5 = inlined_call_operand.vmem [shape: bf16[2,32,256], index: 5, kind: output, shape index: {1}]  }
   0x1   :  { %s898_s20 = smov 0  }
   0x2 LB: > { %s28_s21 = sadd.s32 1, %s855_s19  ;;  %p753_p0 = scmp.ge.s32.totalorder %s859_s20, 1  ;;  %s859_s20 = sphi %s898_s20, %s16_s20   ;;  %s855_s19 = sphi %s896_s19, %s985_s19   ;;  %s851_s18 = sphi %s894_s18, %s984_s18  }
   0x3   : > { %p30_p1 = scmp.ge.s32.totalorder %s28_s21, 2  ;;  %p223_p2 = scmp.lt.s32.totalorder %s859_s20, 3 }
   0x5   : > { %s987_s21 = smov (%p30_p1, %s28_s21), 0  ;;  %p224_p3 = pnand %p753_p0, %p223_p2 }
   0x6   : > { %p274_p4 = scmp.lt.s32.totalorder (!%p224_p3), %s851_s18, 1 }
   0x7   : > { %227 = sbr.rel (%p224_p3) target bundleno = 341 (0x155), region = 36 }
   0xc   : > { %v312_v0 = vld [vmem:[%s980_s2 + $0x10] sm:$0xff]  ;;  %v311_v1 = vld [vmem:[%s980_s2 + $0x8] sm:$0xff]  ;;  %v861_v2 = vmov 1   ;;  %v862_v3 = vmov 2   ;;  %v313_v4 = vld [vmem:[%s980_s2 + $0x18] sm:$0xff]  ;;  %v863_v5 = vmov 0  }
   0xd   : > { %831 = vset.pattern.permute.xlu0 %v861_v2  ;;  %827 = vset.pattern.permute.xlu1 %v861_v2  ;;  %v310_v6 = vld [vmem:[%s980_s2] sm:$0xff]  ;;  %s989_s18 = smov (!%p274_p4, %s851_s18), 1  ;;  %vm497_vm0 = vcmask 261120  }
   0xe   : > { %358 = vperm.xlu1 %827, %v312_v0   ;;  %354 = vperm.xlu0 %831, %v311_v1   ;;  %s928_s30 = sshll.u32 %s989_s18, 5  ;;  %s788_s9 = sshll.u32 %s989_s18, 3 }
   0xf   : > { %828 = vset.pattern.permute.xlu2 %v862_v3  ;;  %s287_s8 = scalar_lea.vmem %s979_s1, %s928_s30  ;;  %s281_s12 = scalar_lea.vmem %s978_s0, %s788_s9 }
  0x10   : > { %396 = vperm.xlu2 %828, %v312_v0   ;;  %v433_v7 = vld [vmem:[%s287_s8] sm:$0xff]  ;;  %v435_v8 = vld [vmem:[%s287_s8 + $0x10] sm:$0xff]  ;;  %v436_v9 = vld [vmem:[%s287_s8 + $0x18] sm:$0xff]  ;;  %s953_s26 = scalar_lea.vmem %s982_s4, %s928_s30  ;;  %s960_s29 = scalar_lea.vmem %s983_s5, %s928_s30 }
  0x11   : > { %v434_v10 = vld [vmem:[%s287_s8 + $0x8] sm:$0xff]  ;;  %v309_v17 = vld [vmem:[%s281_s12] sm:$0x77] }
  0x12   : > { %v335_v19 = vperm.slane %v309_v17, 0  ;;  %v336_v20 = vperm.slane %v309_v17, 4  ;;  %v365_v21 = vperm.slane %v309_v17, 1  ;;  %v366_v22 = vperm.slane %v309_v17, 5 }
  0x13   : > { %v403_v23 = vperm.slane %v309_v17, 2  ;;  %v404_v24 = vperm.slane %v309_v17, 6 }
  0x14   : > { %v339_v25 = vperm.slane %v335_v19, 0  ;;  %v340_v26 = vperm.slane %v336_v20, 0  ;;  %v369_v29 = vperm.slane %v365_v21, 1  ;;  %v370_v30 = vperm.slane %v366_v22, 1 }
  0x15   : > { %v407_v33 = vperm.slane %v403_v23, 2  ;;  %v408_v34 = vperm.slane %v404_v24, 2 }
  0x16   : > { %362 = vperm.xlu1 %827, %v313_v4   ;;  %832 = vset.pattern.permute.xlu0 %v863_v5 }
  0x17   : > { %326 = vperm.xlu0 %832, %v312_v0  }
  0x18   : > { %400 = vperm.xlu2 %828, %v313_v4  }
  0x1e   : > { %829 = vset.pattern.permute.xlu1 %v863_v5 }
  0x1f   : > { %331 = vperm.xlu0 %832, %v313_v4   ;;  %321 = vperm.xlu1 %829, %v311_v1  }
  0x20   : > { %830 = vset.pattern.permute.xlu2 %v861_v2 }
  0x21   : > { %350 = vperm.xlu2 %830, %v310_v6  }
  0x27   : > { %833 = vset.pattern.permute.xlu1 %v862_v3  ;;  %316 = vperm.xlu0 %832, %v310_v6  }
  0x28   : > { %388 = vperm.xlu1 %833, %v310_v6  }
  0x29   : > { %834 = vset.pattern.permute.xlu2 %v862_v3 }
  0x2a   : > { %392 = vperm.xlu2 %834, %v311_v1  }
  0x2f   : > { %439 = vperm.xlu0 %832, %v433_v7  }
  0x30   : > { %835 = vset.pattern.permute.xlu1 %v863_v5 }
  0x31   : > { %449 = vperm.xlu1 %835, %v435_v8  }
  0x32   : > { %836 = vset.pattern.permute.xlu2 %v863_v5 }
  0x33   : > { %454 = vperm.xlu2 %836, %v436_v9  }
  0x39   : > { %444 = vperm.xlu1 %835, %v434_v10  }
  0x6a   : > { %v397_v11 = vpop.permute.xlu2 %396 }
  0x6b   : > { %v413_v52 = vmul.f32 %v407_v33, %v397_v11  ;;  %v414_v53 = vmul.f32 %v408_v34, %v397_v11 }
  0x72   : > { %v401_v14 = vpop.permute.xlu2 %400 }
  0x73   : > { %v415_v44 = vmul.f32 %v407_v33, %v401_v14  ;;  %v416_v45 = vmul.f32 %v408_v34, %v401_v14 }
  0x7b   : > { %v351_v18 = vpop.permute.xlu2 %350 }
  0x7c   : > { %v371_v56 = vmul.f32 %v369_v29, %v351_v18  ;;  %v372_v57 = vmul.f32 %v370_v30, %v351_v18 }
  0x80   : > { %v359_v12 = vpop.permute.xlu1 %358  ;;  %v355_v13 = vpop.permute.xlu0 %354 }
  0x81   : > { %v375_v42 = vmul.f32 %v369_v29, %v359_v12  ;;  %v376_v43 = vmul.f32 %v370_v30, %v359_v12  ;;  %v373_v62 = vmul.f32 %v369_v29, %v355_v13  ;;  %v374_v63 = vmul.f32 %v370_v30, %v355_v13 }
  0x84   : > { %v393_v39 = vpop.permute.xlu2 %392 }
  0x85   : > { %v411_v7 = vmul.f32 %v407_v33, %v393_v39  ;;  %v412_v8 = vmul.f32 %v408_v34, %v393_v39  ;;  %v795_v39 = vld [vmem:[%s981_s3 + $0x18] sm:$0xff] }
  0x88   : > { %v363_v15 = vpop.permute.xlu1 %362 }
  0x89   : > { %v327_v16 = vpop.permute.xlu0 %326  ;;  %v377_v35 = vmul.f32 %v369_v29, %v363_v15  ;;  %v378_v36 = vmul.f32 %v370_v30, %v363_v15 }
  0x8a   : > { %v345_v37 = vmul.f32 %v339_v25, %v327_v16  ;;  %v346_v38 = vmul.f32 %v340_v26, %v327_v16 }
  0x8c   : > { %v383_v47 = vadd.f32 %v375_v42, %v345_v37  ;;  %v384_v48 = vadd.f32 %v376_v43, %v346_v38  ;;  %v794_v37 = vld [vmem:[%s981_s3 + $0x10] sm:$0xff]  ;;  %v793_v38 = vld [vmem:[%s981_s3 + $0x8] sm:$0xff] }
  0x8d   : > { %v455_v4 = vpop.permute.xlu2 %454 }
  0x8e   : > { %v421_v60 = vadd.f32 %v413_v52, %v383_v47  ;;  %v422_v61 = vadd.f32 %v414_v53, %v384_v48 }
  0x90   : > { %v429_v11 = vmax.f32 %v421_v60, 0.0  ;;  %v430_v12 = vmax.f32 %v422_v61, 0.0 }
  0x91   : > { %v332_v27 = vpop.permute.xlu0 %331  ;;  %v322_v28 = vpop.permute.xlu1 %321 }
  0x92   : > { %v347_v31 = vmul.f32 %v339_v25, %v332_v27  ;;  %v348_v32 = vmul.f32 %v340_v26, %v332_v27  ;;  %v343_v58 = vmul.f32 %v339_v25, %v322_v28  ;;  %v344_v59 = vmul.f32 %v340_v26, %v322_v28 }
  0x94   : > { %v385_v40 = vadd.f32 %v377_v35, %v347_v31  ;;  %v386_v41 = vadd.f32 %v378_v36, %v348_v32  ;;  %v381_v9 = vadd.f32 %v373_v62, %v343_v58  ;;  %v382_v10 = vadd.f32 %v374_v63, %v344_v59  ;;  %v792_v36 = vld [vmem:[%s981_s3] sm:$0xff] }
  0x96   : > { %v423_v50 = vadd.f32 %v415_v44, %v385_v40  ;;  %v424_v51 = vadd.f32 %v416_v45, %v386_v41  ;;  %v419_v22 = vadd.f32 %v411_v7, %v381_v9  ;;  %v420_v23 = vadd.f32 %v412_v8, %v382_v10 }
  0x98   : > { %v431_v0 = vmax.f32 %v423_v50, 0.0  ;;  %v432_v1 = vmax.f32 %v424_v51, 0.0  ;;  %v427_v27 = vmax.f32 %v419_v22, 0.0  ;;  %v428_v28 = vmax.f32 %v420_v23, 0.0 }
  0x99   : > { %v317_v46 = vpop.permute.xlu0 %316 }
  0x9a   : > { %v389_v49 = vpop.permute.xlu1 %388  ;;  %v341_v54 = vmul.f32 %v339_v25, %v317_v46  ;;  %v342_v55 = vmul.f32 %v340_v26, %v317_v46  ;;  %v463_v14 = vmul.f32 %v455_v4, %v431_v0  ;;  %v464_v15 = vmul.f32 %v455_v4, %v432_v1 }
  0x9b   : > { %v409_v5 = vmul.f32 %v407_v33, %v389_v49  ;;  %v410_v6 = vmul.f32 %v408_v34, %v389_v49 }
  0x9c   : > { %v379_v2 = vadd.f32 %v371_v56, %v341_v54  ;;  %v380_v3 = vadd.f32 %v372_v57, %v342_v55 }
  0x9e   : > { %v417_v17 = vadd.f32 %v409_v5, %v379_v2  ;;  %v418_v18 = vadd.f32 %v410_v6, %v380_v3 }
  0xa0   : > { %v425_v24 = vmax.f32 %v417_v17, 0.0  ;;  %v426_v25 = vmax.f32 %v418_v18, 0.0 }
  0xa1   : > { %v440_v26 = vpop.permute.xlu0 %439 }
  0xa2   : > { %v457_v30 = vmul.f32 %v440_v26, %v425_v24  ;;  %v458_v31 = vmul.f32 %v440_v26, %v426_v25 }
  0xa3   : > { %v450_v16 = vpop.permute.xlu1 %449 }
  0xa4   : > { %v461_v19 = vmul.f32 %v450_v16, %v429_v11  ;;  %v462_v13 = vmul.f32 %v450_v16, %v430_v12 }
  0xa6   : > { %v475_v20 = vpack.c.bf16 %v463_v14, %v461_v19  ;;  %v476_v21 = vpack.c.bf16 %v464_v15, %v462_v13 }
  0xa8   : > { %516 = vmatpush.bf16.msra.mxu0 %v475_v20  ;;  %796 = vmatpush.bf16.msra.mxu2 %v475_v20 }
  0xa9   : > { %545 = vmatpush.bf16.msra.mxu1 %v476_v21  ;;  %798 = vmatpush.bf16.msra.mxu3 %v476_v21 }
  0xab   : > { %v445_v29 = vpop.permute.xlu1 %444 }
  0xac   : > { %v459_v32 = vmul.f32 %v445_v29, %v427_v27  ;;  %v460_v33 = vmul.f32 %v445_v29, %v428_v28 }
  0xae   : > { %v473_v34 = vpack.c.bf16 %v459_v32, %v457_v30  ;;  %v474_v35 = vpack.c.bf16 %v460_v33, %v458_v31 }
  0xb0   : > { %517 = vmatpush.bf16.msra.mxu0 %v473_v34  ;;  %797 = vmatpush.bf16.msra.mxu2 %v473_v34 }
  0xb1   : > { %546 = vmatpush.bf16.msra.mxu1 %v474_v35  ;;  %799 = vmatpush.bf16.msra.mxu3 %v474_v35 }
  0xb3   : > { %778 = vmatmul.msk.bf16.vlgmr.msra.gmra.mxu0 %vm497_vm0, %v792_v36  ;;  %780 = vmatmul.msk.bf16.vlgmr.msra.gmra.mxu2 %vm497_vm0, %v794_v37 }
  0xb4   : > { %782 = vmatmul.msk.bf16.vlgmr.msra.gmra.mxu1 %vm497_vm0, %v792_v36  ;;  %784 = vmatmul.msk.bf16.vlgmr.msra.gmra.mxu3 %vm497_vm0, %v794_v37 }
  0xc3   : > { %779 = vmatmul.msk.bf16.gmra.mxu0 %vm497_vm0, %v793_v38  ;;  %781 = vmatmul.msk.bf16.gmra.mxu2 %vm497_vm0, %v795_v39 }
  0xc4   : > { %783 = vmatmul.msk.bf16.gmra.mxu1 %vm497_vm0, %v793_v38  ;;  %785 = vmatmul.msk.bf16.gmra.mxu3 %vm497_vm0, %v795_v39 }
 0x130   : > { %v519_v40 = vpop.f32.mrf.mxu0 }
 0x131   : > { %v568_v41 = vmax.f32 %v519_v40, 0.0  ;;  %v548_v42 = vpop.f32.mrf.mxu1 }
 0x132   : > { %v569_v43 = vmax.f32 %v548_v42, 0.0 }
 0x134   : > { %v584_v44 = vpack.c.bf16 %v569_v43, %v568_v41 }
 0x136   : > { %588 = vst [vmem:[%s953_s26] sm:$0xff] %v584_v44  ;;  %v529_v45 = vpop.f32.mrf.mxu2 }
 0x137   : > { %v576_v46 = vmax.f32 %v529_v45, 0.0  ;;  %v558_v47 = vpop.f32.mrf.mxu3 }
 0x138   : > { %v577_v48 = vmax.f32 %v558_v47, 0.0  ;;  %v521_v49 = vpop.f32.mrf.mxu0 }
 0x139   : > { %v570_v50 = vmax.f32 %v521_v49, 0.0  ;;  %v550_v51 = vpop.f32.mrf.mxu1 }
 0x13a   : > { %v592_v52 = vpack.c.bf16 %v577_v48, %v576_v46  ;;  %v571_v53 = vmax.f32 %v550_v51, 0.0 }
 0x13c   : > { %596 = vst [vmem:[%s960_s29] sm:$0xff] %v592_v52  ;;  %v585_v54 = vpack.c.bf16 %v571_v53, %v570_v50 }
 0x13e   : > { %589 = vst [vmem:[%s953_s26 + $0x8] sm:$0xff] %v585_v54  ;;  %v531_v55 = vpop.f32.mrf.mxu2 }
 0x13f   : > { %v578_v56 = vmax.f32 %v531_v55, 0.0  ;;  %v560_v57 = vpop.f32.mrf.mxu3 }
 0x140   : > { %v579_v58 = vmax.f32 %v560_v57, 0.0  ;;  %v524_v59 = vpop.f32.mrf.mxu0 }
 0x141   : > { %v572_v60 = vmax.f32 %v524_v59, 0.0  ;;  %v553_v61 = vpop.f32.mrf.mxu1 }
 0x142   : > { %v593_v62 = vpack.c.bf16 %v579_v58, %v578_v56  ;;  %v573_v63 = vmax.f32 %v553_v61, 0.0 }
 0x144   : > { %597 = vst [vmem:[%s960_s29 + $0x8] sm:$0xff] %v593_v62  ;;  %v586_v0 = vpack.c.bf16 %v573_v63, %v572_v60 }
 0x146   : > { %590 = vst [vmem:[%s953_s26 + $0x10] sm:$0xff] %v586_v0  ;;  %v534_v1 = vpop.f32.mrf.mxu2 }
 0x147   : > { %v580_v2 = vmax.f32 %v534_v1, 0.0  ;;  %v563_v3 = vpop.f32.mrf.mxu3 }
 0x148   : > { %v581_v4 = vmax.f32 %v563_v3, 0.0  ;;  %v526_v5 = vpop.f32.mrf.mxu0 }
 0x149   : > { %v574_v6 = vmax.f32 %v526_v5, 0.0  ;;  %v555_v7 = vpop.f32.mrf.mxu1 }
 0x14a   : > { %v594_v8 = vpack.c.bf16 %v581_v4, %v580_v2  ;;  %v575_v9 = vmax.f32 %v555_v7, 0.0 }
 0x14c   : > { %598 = vst [vmem:[%s960_s29 + $0x10] sm:$0xff] %v594_v8  ;;  %v587_v10 = vpack.c.bf16 %v575_v9, %v574_v6 }
 0x14e   : > { %591 = vst [vmem:[%s953_s26 + $0x18] sm:$0xff] %v587_v10  ;;  %v536_v11 = vpop.f32.mrf.mxu2 }
 0x14f   : > { %v582_v12 = vmax.f32 %v536_v11, 0.0  ;;  %v565_v14 = vpop.f32.mrf.mxu3 }
 0x150   : > { %v583_v15 = vmax.f32 %v565_v14, 0.0 }
 0x152   : > { %v595_v16 = vpack.c.bf16 %v583_v15, %v582_v12 }
 0x154   : > { %599 = vst [vmem:[%s960_s29 + $0x18] sm:$0xff] %v595_v16 }
 0x155 PF: > { %s16_s20 = sadd.s32 1, %s859_s20   ;;  %s984_s18 = smov %s855_s19 }
 0x156   : > { %p13_p5 = scmp.ge.s32.totalorder %s16_s20, 4   ;;  %s985_s19 = smov %s987_s21 }
 0x158   :  { %15 = sbr.rel (!%p13_p5) target bundleno = 2 (0x2), region = 81 }

// kernel: ffmc_forward.4
= control target key start
LH: loop header
LB: loop body
LE: loop exit
PB: predicated region body
PF: predicated region fallthrough
CT: control target
= control target key end

     0   :  { %s450_s9 = smov 0   ;;  %s452_s10 = smov 0   ;;  %s490_s0 = inlined_call_operand.vmem [shape: bf16[2,32,256], index: 0, kind: input, shape index: {}]   ;;  %s491_s1 = inlined_call_operand.vmem [shape: f32[2,32,1], index: 1, kind: input, shape index: {}]   ;;  %s492_s2 = inlined_call_operand.vmem [shape: f32[2,1,256], index: 2, kind: output, shape index: {}]  }
   0x1   :  { %s454_s11 = smov 0  }
   0x2 LB: > { %s24_s12 = sadd.s32 1, %s428_s10  ;;  %p373_p0 = scmp.ge.s32.totalorder %s432_s11, 1  ;;  %s432_s11 = sphi %s454_s11, %s12_s11   ;;  %s428_s10 = sphi %s452_s10, %s494_s10   ;;  %s424_s9 = sphi %s450_s9, %s493_s9  }
   0x3   : > { %p26_p1 = scmp.ge.s32.totalorder %s24_s12, 2  ;;  %p143_p2 = scmp.lt.s32.totalorder %s432_s11, 3 }
   0x5   : > { %s496_s12 = smov (%p26_p1, %s24_s12), 0  ;;  %p144_p3 = pnand %p373_p0, %p143_p2 }
   0x6   : > { %p178_p4 = scmp.lt.s32.totalorder (!%p144_p3), %s424_s9, 1 }
   0x7   : > { %147 = sbr.rel (%p144_p3) target bundleno = 165 (0xa5), region = 28 }
   0xc   : > { %v434_v0 = vmov 0   ;;  %s498_s9 = smov (!%p178_p4, %s424_s9), 1  ;;  %v271_v45 = vlaneseq  ;;  %vm268_vm0 = vcmask 1040384  }
   0xd   : > { %409 = vset.pattern.permute.xlu1 %v434_v0  ;;  %408 = vset.pattern.permute.xlu0 %v434_v0  ;;  %s381_s13 = sshll.u32 %s498_s9, 5  ;;  %s378_s20 = sshll.u32 %s498_s9, 1 }
   0xe   : > { %s191_s16 = scalar_lea.vmem %s491_s1, %s381_s13  ;;  %s185_s19 = scalar_lea.vmem %s490_s0, %s381_s13  ;;  %vm273_vm1 = vcmp.lt.s32.totalorder %v271_v45, 256 }
   0xf   : > { %v207_v1 = vld [vmem:[%s191_s16 + $0x10] sm:$0xff]  ;;  %v205_v2 = vld [vmem:[%s191_s16] sm:$0xff]  ;;  %v208_v3 = vld [vmem:[%s191_s16 + $0x18] sm:$0xff]  ;;  %s199_s23 = scalar_lea.vmem %s492_s2, %s378_s20 }
  0x10   : > { %229 = vperm.xlu1 %409, %v207_v1   ;;  %219 = vperm.xlu0 %408, %v205_v2   ;;  %v206_v4 = vld [vmem:[%s191_s16 + $0x8] sm:$0xff]  ;;  %v201_v7 = vld [vmem:[%s185_s19] sm:$0xff]  ;;  %v203_v9 = vld [vmem:[%s185_s19 + $0x10] sm:$0xff] }
  0x11   : > { %v202_v8 = vld [vmem:[%s185_s19 + $0x8] sm:$0xff]  ;;  %v209_v10 = vunpack.c.l.bf16 %v201_v7  ;;  %v210_v11 = vunpack.c.h.bf16 %v201_v7  ;;  %v204_v12 = vld [vmem:[%s185_s19 + $0x18] sm:$0xff]  ;;  %v213_v15 = vunpack.c.l.bf16 %v203_v9  ;;  %v214_v16 = vunpack.c.h.bf16 %v203_v9 }
  0x12   : > { %v211_v13 = vunpack.c.l.bf16 %v202_v8  ;;  %v212_v14 = vunpack.c.h.bf16 %v202_v8  ;;  %v215_v17 = vunpack.c.l.bf16 %v204_v12  ;;  %v216_v18 = vunpack.c.h.bf16 %v204_v12 }
  0x18   : > { %234 = vperm.xlu1 %409, %v208_v3   ;;  %224 = vperm.xlu0 %408, %v206_v4  }
  0x82   : > { %v230_v5 = vpop.permute.xlu1 %229  ;;  %v220_v6 = vpop.permute.xlu0 %219 }
  0x83   : > { %v237_v20 = vmul.f32 %v220_v6, %v209_v10  ;;  %v238_v21 = vmul.f32 %v220_v6, %v210_v11  ;;  %v241_v25 = vmul.f32 %v230_v5, %v213_v15  ;;  %v242_v26 = vmul.f32 %v230_v5, %v214_v16 }
  0x8a   : > { %v225_v19 = vpop.permute.xlu0 %224  ;;  %v235_v24 = vpop.permute.xlu1 %234 }
  0x8b   : > { %v239_v22 = vmul.f32 %v225_v19, %v211_v13  ;;  %v240_v23 = vmul.f32 %v225_v19, %v212_v14  ;;  %v243_v29 = vmul.f32 %v235_v24, %v215_v17  ;;  %v244_v30 = vmul.f32 %v235_v24, %v216_v18 }
  0x8d   : > { %v245_v27 = vadd.f32 %v239_v22, %v237_v20  ;;  %v254_v28 = vadd.f32 %v240_v23, %v238_v21 }
  0x8f   : > { %v246_v31 = vadd.f32 %v245_v27, %v241_v25  ;;  %v255_v32 = vadd.f32 %v254_v28, %v242_v26 }
  0x91   : > { %v247_v33 = vadd.f32 %v246_v31, %v243_v29  ;;  %v256_v34 = vadd.f32 %v255_v32, %v244_v30 }
  0x93   : > { %v248_v35 = vrot.slane %v247_v33, 4  ;;  %v257_v36 = vrot.slane %v256_v34, 4 }
  0x95   : > { %v249_v37 = vadd.f32 %v248_v35, %v247_v33  ;;  %v258_v38 = vadd.f32 %v257_v36, %v256_v34 }
  0x97   : > { %v250_v39 = vrot.slane %v249_v37, 2  ;;  %v259_v40 = vrot.slane %v258_v38, 2 }
  0x99   : > { %v251_v41 = vadd.f32 %v250_v39, %v249_v37  ;;  %v260_v42 = vadd.f32 %v259_v40, %v258_v38 }
  0x9b   : > { %v252_v43 = vrot.slane %v251_v41, 1  ;;  %v261_v44 = vrot.slane %v260_v42, 1 }
  0x9d   : > { %v253_v46 = vadd.f32 %v252_v43, %v251_v41  ;;  %v262_v47 = vadd.f32 %v261_v44, %v260_v42 }
  0x9f   : > { %v264_v48 = vmul.f32 0.17677669, %v262_v47  ;;  %v263_v49 = vmul.f32 0.17677669, %v253_v46 }
  0xa1   : > { %v267_v50 = vrot.slane %v264_v48, 7 }
  0xa3   : > { %v269_v51 = vsel %vm268_vm0, %v263_v49, %v267_v50 }
  0xa4   : > { %275 = vst.msk [vmem:[%s199_s23] sm:$0x3] %vm273_vm1, %v269_v51 }
  0xa5 PF: > { %s12_s11 = sadd.s32 1, %s432_s11   ;;  %s493_s9 = smov %s428_s10 }
  0xa6   : > { %p9_p5 = scmp.ge.s32.totalorder %s12_s11, 4   ;;  %s494_s10 = smov %s496_s12 }
  0xa8   :  { %11 = sbr.rel (!%p9_p5) target bundleno = 2 (0x2), region = 61 }

// kernel: ffmc_forward.5
= control target key start
LH: loop header
LB: loop body
LE: loop exit
PB: predicated region body
PF: predicated region fallthrough
CT: control target
= control target key end

     0   :  { %s1655_s27 = smov 0   ;;  %s1657_s28 = smov 0   ;;  %s1899_s0 = inlined_call_operand.vmem [shape: bf16[2,32,256], index: 0, kind: input, shape index: {}]   ;;  %s1900_s1 = inlined_call_operand.vmem [shape: bf16[2,32,256], index: 1, kind: input, shape index: {}]   ;;  %s1901_s2 = inlined_call_operand.vmem [shape: f32[2,32,1], index: 2, kind: input, shape index: {}]   ;;  %s1902_s3 = inlined_call_operand.vmem [shape: f32[2,32,1], index: 3, kind: input, shape index: {}]   ;;  %s1903_s4 = inlined_call_operand.vmem [shape: bf16[256,32], index: 4, kind: input, shape index: {}]   ;;  %s1904_s5 = inlined_call_operand.vmem [shape: bf16[32,256], index: 5, kind: input, shape index: {}]   ;;  %s1905_s6 = inlined_call_operand.vmem [shape: bf16[32,32], index: 6, kind: input, shape index: {}]   ;;  %s1906_s7 = inlined_call_operand.vmem [shape: f32[32,1], index: 7, kind: input, shape index: {}]   ;;  %s1907_s8 = inlined_call_operand.vmem [shape: f32[2,1,256], index: 8, kind: output, shape index: {}]  }
   0x1   :  { %s1659_s29 = smov 0  }
   0x2 LB: > { %s30_s30 = sadd.s32 1, %s1603_s28  ;;  %p1381_p0 = scmp.ge.s32.totalorder %s1607_s29, 1  ;;  %s1607_s29 = sphi %s1659_s29, %s18_s29   ;;  %s1603_s28 = sphi %s1657_s28, %s1909_s28   ;;  %s1599_s27 = sphi %s1655_s27, %s1908_s27  }
   0x3   : > { %p32_p1 = scmp.ge.s32.totalorder %s30_s30, 2  ;;  %p320_p2 = scmp.lt.s32.totalorder %s1607_s29, 3 }
   0x5   : > { %s1911_s30 = smov (%p32_p1, %s30_s30), 0  ;;  %p321_p3 = pnand %p1381_p0, %p320_p2 }
   0x6   : > { %p381_p4 = scmp.lt.s32.totalorder (!%p321_p3), %s1599_s27, 1 }
   0x7   : > { %324 = sbr.rel (%p321_p3) target bundleno = 908 (0x38c), region = 52 }
   0xc   : > { %v1609_v0 = vmov 0   ;;  %s1913_s27 = smov (!%p381_p4, %s1599_s27), 1  ;;  %v1192_v7 = vld [vmem:[%s1906_s7 + $0x8] sm:$0xff]  ;;  %v1193_v8 = vld [vmem:[%s1906_s7 + $0x10] sm:$0xff]  ;;  %v1523_v37 = vld [vmem:[%s1903_s4] sm:$0xff]  ;;  %vm580_vm0 = vcmask 261120  }
   0xd   : > { %1575 = vset.pattern.permute.xlu1 %v1609_v0  ;;  %1574 = vset.pattern.permute.xlu0 %v1609_v0  ;;  %s1676_s9 = sshll.u32 %s1913_s27, 5  ;;  %v1535_v38 = vld [vmem:[%s1903_s4 + $0x60] sm:$0xff]  ;;  %v1524_v39 = vld [vmem:[%s1903_s4 + $0x8] sm:$0xff]  ;;  %v1525_v41 = vld [vmem:[%s1903_s4 + $0x10] sm:$0xff]  ;;  %s1390_s16 = sshll.u32 %s1913_s27, 1  ;;  %vm1246_vm9 = vcmask 1040384  }
   0xe   : > { %1576 = vset.pattern.permute.xlu2 %v1609_v0  ;;  %s404_s12 = scalar_lea.vmem %s1901_s2, %s1676_s9  ;;  %s1686_s15 = scalar_lea.vmem %s1902_s3, %s1676_s9  ;;  %v1536_v40 = vld [vmem:[%s1903_s4 + $0x68] sm:$0xff]  ;;  %v1537_v42 = vld [vmem:[%s1903_s4 + $0x70] sm:$0xff]  ;;  %v1526_v43 = vld [vmem:[%s1903_s4 + $0x18] sm:$0xff] }
   0xf   : > { %v426_v1 = vld [vmem:[%s404_s12 + $0x10] sm:$0xff]  ;;  %v424_v2 = vld [vmem:[%s404_s12] sm:$0xff]  ;;  %v427_v3 = vld [vmem:[%s404_s12 + $0x18] sm:$0xff]  ;;  %s388_s22 = scalar_lea.vmem %s1899_s0, %s1676_s9  ;;  %s398_s11 = scalar_lea.vmem %s1900_s1, %s1676_s9 }
  0x10   : > { %448 = vperm.xlu0 %1574, %v426_v1   ;;  %438 = vperm.xlu1 %1575, %v424_v2   ;;  %v425_v4 = vld [vmem:[%s404_s12 + $0x8] sm:$0xff]  ;;  %v1013_v5 = vld [vmem:[%s1686_s15 + $0x10] sm:$0xff]  ;;  %v1014_v6 = vld [vmem:[%s1686_s15 + $0x18] sm:$0xff]  ;;  %s417_s19 = scalar_lea.vmem %s1907_s8, %s1390_s16 }
  0x11   : > { %v422_v11 = vld [vmem:[%s388_s22 + $0x10] sm:$0xff]  ;;  %v423_v12 = vld [vmem:[%s388_s22 + $0x18] sm:$0xff]  ;;  %v421_v13 = vld [vmem:[%s388_s22 + $0x8] sm:$0xff] }
  0x12   : > { %v432_v14 = vunpack.c.l.bf16 %v422_v11  ;;  %v433_v15 = vunpack.c.h.bf16 %v422_v11  ;;  %v420_v16 = vld [vmem:[%s388_s22] sm:$0xff]  ;;  %v434_v17 = vunpack.c.l.bf16 %v423_v12  ;;  %v435_v18 = vunpack.c.h.bf16 %v423_v12  ;;  %v1538_v44 = vld [vmem:[%s1903_s4 + $0x78] sm:$0xff]  ;;  %v1528_v46 = vld [vmem:[%s1903_s4 + $0x28] sm:$0xff] }
  0x13   : > { %v430_v19 = vunpack.c.l.bf16 %v421_v13  ;;  %v428_v20 = vunpack.c.l.bf16 %v420_v16  ;;  %v431_v23 = vunpack.c.h.bf16 %v421_v13  ;;  %v429_v28 = vunpack.c.h.bf16 %v420_v16  ;;  %v1527_v45 = vld [vmem:[%s1903_s4 + $0x20] sm:$0xff]  ;;  %v1534_v47 = vld [vmem:[%s1903_s4 + $0x58] sm:$0xff]  ;;  %v1529_v48 = vld [vmem:[%s1903_s4 + $0x30] sm:$0xff] }
  0x14   : > { %v1530_v49 = vld [vmem:[%s1903_s4 + $0x38] sm:$0xff]  ;;  %v1531_v50 = vld [vmem:[%s1903_s4 + $0x40] sm:$0xff]  ;;  %v1532_v63 = vld [vmem:[%s1903_s4 + $0x48] sm:$0xff] }
  0x15   : > { %v1533_v12 = vld [vmem:[%s1903_s4 + $0x50] sm:$0xff] }
  0x18   : > { %453 = vperm.xlu0 %1574, %v427_v3   ;;  %443 = vperm.xlu1 %1575, %v425_v4  }
  0x20   : > { %1027 = vperm.xlu0 %1574, %v1013_v5   ;;  %1032 = vperm.xlu1 %1575, %v1014_v6  }
  0x28   : > { %1202 = vperm.xlu0 %1574, %v1192_v7   ;;  %1207 = vperm.xlu1 %1575, %v1193_v8  }
  0x82   : > { %v449_v9 = vpop.permute.xlu0 %448  ;;  %v439_v10 = vpop.permute.xlu1 %438 }
  0x83   : > { %v460_v24 = vmul.f32 %v449_v9, %v432_v14  ;;  %v461_v25 = vmul.f32 %v449_v9, %v433_v15  ;;  %v456_v33 = vmul.f32 %v439_v10, %v428_v20  ;;  %v457_v34 = vmul.f32 %v439_v10, %v429_v28 }
  0x8a   : > { %v454_v21 = vpop.permute.xlu0 %453  ;;  %v444_v22 = vpop.permute.xlu1 %443 }
  0x8b   : > { %v462_v26 = vmul.f32 %v454_v21, %v434_v17  ;;  %v463_v27 = vmul.f32 %v454_v21, %v435_v18  ;;  %v458_v29 = vmul.f32 %v444_v22, %v430_v19  ;;  %v459_v32 = vmul.f32 %v444_v22, %v431_v23 }
  0x8d   : > { %v466_v30 = vpack.c.bf16 %v462_v26, %v460_v24  ;;  %v467_v31 = vpack.c.bf16 %v463_v27, %v461_v25  ;;  %v464_v35 = vpack.c.bf16 %v458_v29, %v456_v33  ;;  %v465_v36 = vpack.c.bf16 %v459_v32, %v457_v34 }
  0x8f   : > { %635 = vmatpush.bf16.msra.mxu0 %v466_v30  ;;  %1545 = vmatpush.bf16.msra.mxu2 %v466_v30 }
  0x90   : > { %724 = vmatpush.bf16.msra.mxu1 %v467_v31  ;;  %1547 = vmatpush.bf16.msra.mxu3 %v467_v31 }
  0x93   : > { %636 = vmatpush.bf16.msra.mxu0 %v464_v35  ;;  %1546 = vmatpush.bf16.msra.mxu2 %v464_v35 }
  0x94   : > { %725 = vmatpush.bf16.msra.mxu1 %v465_v36  ;;  %1548 = vmatpush.bf16.msra.mxu3 %v465_v36 }
  0x96   : > { %1455 = vmatmul.msk.bf16.vlgmr.msra.gmra.mxu0 %vm580_vm0, %v1523_v37  ;;  %1467 = vmatmul.msk.bf16.vlgmr.msra.gmra.mxu2 %vm580_vm0, %v1535_v38 }
  0x97   : > { %1471 = vmatmul.msk.bf16.vlgmr.msra.gmra.mxu1 %vm580_vm0, %v1523_v37  ;;  %1482 = vmatmul.msk.bf16.vlgmr.msra.gmra.mxu3 %vm580_vm0, %v1534_v47 }
  0xa6   : > { %1456 = vmatmul.msk.bf16.gmra.mxu0 %vm580_vm0, %v1524_v39  ;;  %1468 = vmatmul.msk.bf16.gmra.mxu2 %vm580_vm0, %v1536_v40 }
  0xa7   : > { %1472 = vmatmul.msk.bf16.gmra.mxu1 %vm580_vm0, %v1524_v39  ;;  %1483 = vmatmul.msk.bf16.gmra.mxu3 %vm580_vm0, %v1535_v38 }
  0xb6   : > { %1457 = vmatmul.msk.bf16.gmra.mxu0 %vm580_vm0, %v1525_v41  ;;  %1469 = vmatmul.msk.bf16.gmra.mxu2 %vm580_vm0, %v1537_v42 }
  0xb7   : > { %1473 = vmatmul.msk.bf16.gmra.mxu1 %vm580_vm0, %v1525_v41  ;;  %1484 = vmatmul.msk.bf16.gmra.mxu3 %vm580_vm0, %v1536_v40 }
  0xc6   : > { %1458 = vmatmul.msk.bf16.gmra.mxu0 %vm580_vm0, %v1526_v43  ;;  %1470 = vmatmul.msk.bf16.gmra.mxu2 %vm580_vm0, %v1538_v44 }
  0xc7   : > { %1474 = vmatmul.msk.bf16.gmra.mxu1 %vm580_vm0, %v1526_v43  ;;  %1485 = vmatmul.msk.bf16.gmra.mxu3 %vm580_vm0, %v1537_v42 }
  0xd6   : > { %1459 = vmatmul.msk.bf16.gmra.mxu0 %vm580_vm0, %v1527_v45 }
  0xd7   : > { %1475 = vmatmul.msk.bf16.gmra.mxu1 %vm580_vm0, %v1527_v45  ;;  %1486 = vmatmul.msk.bf16.gmra.mxu3 %vm580_vm0, %v1538_v44 }
  0xe6   : > { %1460 = vmatmul.msk.bf16.gmra.mxu0 %vm580_vm0, %v1528_v46 }
  0xe7   : > { %1476 = vmatmul.msk.bf16.gmra.mxu1 %vm580_vm0, %v1528_v46 }
  0xf6   : > { %1461 = vmatmul.msk.bf16.gmra.mxu0 %vm580_vm0, %v1529_v48 }
  0xf7   : > { %1477 = vmatmul.msk.bf16.gmra.mxu1 %vm580_vm0, %v1529_v48 }
 0x106   : > { %1462 = vmatmul.msk.bf16.gmra.mxu0 %vm580_vm0, %v1530_v49 }
 0x107   : > { %1478 = vmatmul.msk.bf16.gmra.mxu1 %vm580_vm0, %v1530_v49 }
 0x113   : > { %v638_v51 = vpop.f32.mrf.mxu0 }
 0x114   : > { %v727_v52 = vpop.f32.mrf.mxu1  ;;  %v807_v56 = vmax.f32 %v638_v51, 0.0 }
 0x115   : > { %v808_v55 = vmax.f32 %v727_v52, 0.0 }
 0x116   : > { %1463 = vmatmul.msk.bf16.gmra.mxu0 %vm580_vm0, %v1531_v50 }
 0x117   : > { %1479 = vmatmul.msk.bf16.gmra.mxu1 %vm580_vm0, %v1531_v50 }
 0x119   : > { %v1768_v53 = vpop.f32.mrf.mxu2 }
 0x11a   : > { %v855_v46 = vmax.f32 %v1768_v53, 0.0 }
 0x11b   : > { %v640_v54 = vpop.f32.mrf.mxu0 }
 0x11c   : > { %v809_v57 = vmax.f32 %v640_v54, 0.0  ;;  %v729_v58 = vpop.f32.mrf.mxu1 }
 0x11d   : > { %v810_v59 = vmax.f32 %v729_v58, 0.0 }
 0x11e   : > { %v1770_v60 = vpack.c.bf16 %v809_v57, %v807_v56  ;;  %v782_v56 = vpop.f32.mrf.mxu3 }
 0x11f   : > { %v1772_v61 = vpack.c.bf16 %v810_v59, %v808_v55  ;;  %v852_v59 = vmax.f32 %v782_v56, 0.0 }
 0x121   : > { %v1774_v62 = vpop.f32.mrf.mxu2 }
 0x123   : > { %v643_v0 = vpop.f32.mrf.mxu0 }
 0x124   : > { %v732_v1 = vpop.f32.mrf.mxu1  ;;  %v811_v5 = vmax.f32 %v643_v0, 0.0 }
 0x125   : > { %v812_v4 = vmax.f32 %v732_v1, 0.0 }
 0x126   : > { %1464 = vmatmul.msk.bf16.gmra.mxu0 %vm580_vm0, %v1532_v63 }
 0x127   : > { %1480 = vmatmul.msk.bf16.gmra.mxu1 %vm580_vm0, %v1532_v63  ;;  %v784_v63 = vpop.f32.mrf.mxu3 }
 0x128   : > { %v854_v53 = vmax.f32 %v784_v63, 0.0 }
 0x129   : > { %v703_v2 = vpop.f32.mrf.mxu2 }
 0x12a   : > { %v859_v43 = vmax.f32 %v703_v2, 0.0  ;;  %v1804_v0 = vpack.c.bf16 %v854_v53, %v852_v59 }
 0x12b   : > { %v645_v3 = vpop.f32.mrf.mxu0 }
 0x12c   : > { %v813_v6 = vmax.f32 %v645_v3, 0.0  ;;  %v734_v7 = vpop.f32.mrf.mxu1 }
 0x12d   : > { %v814_v8 = vmax.f32 %v734_v7, 0.0 }
 0x12e   : > { %v1782_v9 = vpack.c.bf16 %v813_v6, %v811_v5 }
 0x12f   : > { %v1784_v10 = vpack.c.bf16 %v814_v8, %v812_v4 }
 0x131   : > { %v705_v11 = vpop.f32.mrf.mxu2 }
 0x132   : > { %v861_v44 = vmax.f32 %v705_v11, 0.0 }
 0x133   : > { %v648_v13 = vpop.f32.mrf.mxu0 }
 0x134   : > { %v737_v14 = vpop.f32.mrf.mxu1  ;;  %v815_v18 = vmax.f32 %v648_v13, 0.0  ;;  %v901_v48 = vpack.c.bf16 %v861_v44, %v859_v43 }
 0x135   : > { %v816_v17 = vmax.f32 %v737_v14, 0.0 }
 0x136   : > { %1465 = vmatmul.msk.bf16.gmra.mxu0 %vm580_vm0, %v1533_v12 }
 0x137   : > { %1481 = vmatmul.msk.bf16.gmra.mxu1 %vm580_vm0, %v1533_v12  ;;  %v1806_v12 = vpop.f32.mrf.mxu3 }
 0x139   : > { %v708_v15 = vpop.f32.mrf.mxu2 }
 0x13a   : > { %v863_v38 = vmax.f32 %v708_v15, 0.0 }
 0x13b   : > { %v650_v16 = vpop.f32.mrf.mxu0 }
 0x13c   : > { %v817_v19 = vmax.f32 %v650_v16, 0.0  ;;  %v739_v20 = vpop.f32.mrf.mxu1 }
 0x13d   : > { %v818_v21 = vmax.f32 %v739_v20, 0.0 }
 0x13e   : > { %v1791_v22 = vpack.c.bf16 %v817_v19, %v815_v18 }
 0x13f   : > { %v1793_v23 = vpack.c.bf16 %v818_v21, %v816_v17 }
 0x141   : > { %v710_v24 = vpop.f32.mrf.mxu2 }
 0x142   : > { %v865_v39 = vmax.f32 %v710_v24, 0.0  ;;  %v1810_v24 = vpop.f32.mrf.mxu3 }
 0x143   : > { %v653_v25 = vpop.f32.mrf.mxu0 }
 0x144   : > { %v742_v26 = vpop.f32.mrf.mxu1  ;;  %v819_v30 = vmax.f32 %v653_v25, 0.0  ;;  %v903_v45 = vpack.c.bf16 %v865_v39, %v863_v38 }
 0x145   : > { %v820_v29 = vmax.f32 %v742_v26, 0.0 }
 0x146   : > { %1466 = vmatmul.msk.bf16.gmra.mxu0 %vm580_vm0, %v1534_v47  ;;  %v857_v47 = vmax.f32 %v1774_v62, 0.0 }
 0x148   : > { %v899_v51 = vpack.c.bf16 %v857_v47, %v855_v46 }
 0x149   : > { %v713_v27 = vpop.f32.mrf.mxu2 }
 0x14a   : > { %v867_v36 = vmax.f32 %v713_v27, 0.0 }
 0x14b   : > { %v655_v28 = vpop.f32.mrf.mxu0 }
 0x14c   : > { %v821_v31 = vmax.f32 %v655_v28, 0.0  ;;  %v744_v32 = vpop.f32.mrf.mxu1  ;;  %v1814_v28 = vpop.f32.mrf.mxu3 }
 0x14d   : > { %v822_v33 = vmax.f32 %v744_v32, 0.0 }
 0x14e   : > { %v881_v34 = vpack.c.bf16 %v821_v31, %v819_v30 }
 0x14f   : > { %v1796_v35 = vpack.c.bf16 %v822_v33, %v820_v29 }
 0x151   : > { %v715_v37 = vpop.f32.mrf.mxu2 }
 0x152   : > { %v869_v40 = vmax.f32 %v715_v37, 0.0 }
 0x153   : > { %v658_v41 = vpop.f32.mrf.mxu0 }
 0x154   : > { %v905_v42 = vpack.c.bf16 %v869_v40, %v867_v36  ;;  %v1800_v50 = vpop.f32.mrf.mxu1  ;;  %v823_v20 = vmax.f32 %v658_v41, 0.0  ;;  %v1819_v38 = vpop.f32.mrf.mxu3 }
 0x155   : > { %v824_v41 = vmax.f32 %v1800_v50, 0.0 }
 0x156   : > { %946 = vmatpush.bf16.msrb.mxu3 %v905_v42 }
 0x15a   : > { %947 = vmatpush.bf16.msrb.mxu3 %v903_v45 }
 0x15b   : > { %v660_v49 = vpop.f32.mrf.mxu0 }
 0x15c   : > { %v1802_v54 = vpop.f32.mrf.mxu1  ;;  %v825_v18 = vmax.f32 %v660_v49, 0.0  ;;  %v797_v45 = vpop.f32.mrf.mxu3 }
 0x15e   : > { %948 = vmatpush.bf16.msrb.mxu3 %v901_v48  ;;  %v883_v25 = vpack.c.bf16 %v825_v18, %v823_v20  ;;  %v862_v20 = vmax.f32 %v1819_v38, 0.0 }
 0x162   : > { %949 = vmatpush.bf16.msrb.mxu3 %v899_v51 }
 0x163   : > { %v663_v52 = vpop.f32.mrf.mxu0 }
 0x164   : > { %v752_v57 = vpop.f32.mrf.mxu1  ;;  %v827_v17 = vmax.f32 %v663_v52, 0.0  ;;  %v799_v49 = vpop.f32.mrf.mxu3  ;;  %v1497_v52 = vld [vmem:[%s1904_s5 + $0x10] sm:$0xf] }
 0x16b   : > { %v665_v55 = vpop.f32.mrf.mxu0 }
 0x16c   : > { %v754_v62 = vpop.f32.mrf.mxu1  ;;  %v829_v14 = vmax.f32 %v665_v55, 0.0 }
 0x16d   : > { %v830_v39 = vmax.f32 %v754_v62, 0.0 }
 0x16e   : > { %v885_v19 = vpack.c.bf16 %v829_v14, %v827_v17  ;;  %v864_v14 = vmax.f32 %v797_v45, 0.0 }
 0x173   : > { %v668_v58 = vpop.f32.mrf.mxu0 }
 0x174   : > { %v757_v3 = vpop.f32.mrf.mxu1  ;;  %v831_v13 = vmax.f32 %v668_v58, 0.0 }
 0x175   : > { %v832_v33 = vmax.f32 %v757_v3, 0.0 }
 0x17b   : > { %v670_v1 = vpop.f32.mrf.mxu0 }
 0x17c   : > { %v833_v7 = vmax.f32 %v670_v1, 0.0  ;;  %v759_v11 = vpop.f32.mrf.mxu1 }
 0x17d   : > { %v834_v36 = vmax.f32 %v759_v11, 0.0  ;;  %v1491_v11 = vld [vmem:[%s1904_s5 + $0x8] sm:$0xf0] }
 0x17e   : > { %v887_v15 = vpack.c.bf16 %v833_v7, %v831_v13 }
 0x17f   : > { %v888_v40 = vpack.c.bf16 %v834_v36, %v832_v33 }
 0x183   : > { %v673_v2 = vpop.f32.mrf.mxu0 }
 0x184   : > { %v835_v5 = vmax.f32 %v673_v2, 0.0  ;;  %v762_v21 = vpop.f32.mrf.mxu1 }
 0x185   : > { %v836_v30 = vmax.f32 %v762_v21, 0.0 }
 0x18b   : > { %v675_v4 = vpop.f32.mrf.mxu0 }
 0x18c   : > { %v837_v6 = vmax.f32 %v675_v4, 0.0  ;;  %v764_v27 = vpop.f32.mrf.mxu1 }
 0x18d   : > { %v838_v31 = vmax.f32 %v764_v27, 0.0  ;;  %v858_v27 = vmax.f32 %v1810_v24, 0.0 }
 0x18e   : > { %v889_v8 = vpack.c.bf16 %v837_v6, %v835_v5 }
 0x18f   : > { %v890_v32 = vpack.c.bf16 %v838_v31, %v836_v30 }
 0x190   : > { %927 = vmatpush.bf16.msrb.mxu2 %v889_v8  ;;  %v1539_v8 = vld [vmem:[%s1904_s5 + $0x4] sm:$0xf] }
 0x191   : > { %v1494_v18 = vor.u32 %v1539_v8, %v1491_v11 }
 0x193   : > { %v1808_v16 = vpop.f32.mrf.mxu0 }
 0x194   : > { %928 = vmatpush.bf16.msrb.mxu2 %v887_v15  ;;  %v1829_v46 = vpop.f32.mrf.mxu1  ;;  %v839_v7 = vmax.f32 %v1808_v16, 0.0  ;;  %v866_v15 = vmax.f32 %v799_v49, 0.0  ;;  %v860_v16 = vmax.f32 %v1814_v28, 0.0  ;;  %v1541_v28 = vld [vmem:[%s1904_s5 + $0x14] sm:$0xf] }
 0x196   : > { %v904_v21 = vpack.c.bf16 %v866_v15, %v864_v14 }
 0x198   : > { %929 = vmatpush.bf16.msrb.mxu2 %v885_v19 }
 0x19b   : > { %v1812_v26 = vpop.f32.mrf.mxu0 }
 0x19c   : > { %930 = vmatpush.bf16.msrb.mxu2 %v883_v25  ;;  %v1832_v50 = vpop.f32.mrf.mxu1  ;;  %v841_v4 = vmax.f32 %v1812_v26, 0.0  ;;  %v1011_v25 = vld [vmem:[%s1686_s15] sm:$0xff]  ;;  %v856_v26 = vmax.f32 %v1806_v12, 0.0 }
 0x19d   : > { %1017 = vperm.xlu2 %1576, %v1011_v25  }
 0x19e   : > { %v891_v13 = vpack.c.bf16 %v841_v4, %v839_v7  ;;  %v900_v30 = vpack.c.bf16 %v858_v27, %v856_v26 }
 0x1a0   : > { %931 = vmatpush.bf16.msrb.mxu2 %v881_v34  ;;  %v828_v34 = vmax.f32 %v752_v57, 0.0 }
 0x1a2   : > { %v886_v42 = vpack.c.bf16 %v830_v39, %v828_v34  ;;  %v1012_v34 = vld [vmem:[%s1686_s15 + $0x8] sm:$0xff]  ;;  %v840_v39 = vmax.f32 %v1829_v46, 0.0 }
 0x1a3   : > { %v683_v29 = vpop.f32.mrf.mxu0 }
 0x1a4   : > { %932 = vmatpush.bf16.msrb.mxu2 %v1791_v22  ;;  %v826_v22 = vmax.f32 %v1802_v54, 0.0  ;;  %v1542_v54 = vld [vmem:[%s1904_s5 + $0x14] sm:$0xf0]  ;;  %v772_v56 = vpop.f32.mrf.mxu1  ;;  %v843_v1 = vmax.f32 %v683_v29, 0.0  ;;  %v902_v29 = vpack.c.bf16 %v862_v20, %v860_v16 }
 0x1a5   : > { %v1498_v55 = vor.u32 %v1542_v54, %v1497_v52  ;;  %v844_v24 = vmax.f32 %v772_v56, 0.0  ;;  %1022 = vperm.xlu2 %1576, %v1012_v34  }
 0x1a6   : > { %v884_v47 = vpack.c.bf16 %v826_v22, %v824_v41  ;;  %v1191_v22 = vld [vmem:[%s1906_s7] sm:$0xff] }
 0x1a8   : > { %933 = vmatpush.bf16.msrb.mxu2 %v1782_v9  ;;  %v1489_v9 = vld [vmem:[%s1904_s5] sm:$0xf] }
 0x1ab   : > { %v685_v37 = vpop.f32.mrf.mxu0 }
 0x1ac   : > { %934 = vmatpush.bf16.msrb.mxu2 %v1770_v60  ;;  %v1540_v60 = vld [vmem:[%s1904_s5 + $0x4] sm:$0xf0]  ;;  %v845_v53 = vmax.f32 %v685_v37, 0.0  ;;  %v774_v3 = vpop.f32.mrf.mxu1 }
 0x1ad   : > { %v1490_v44 = vor.u32 %v1540_v60, %v1489_v9  ;;  %v846_v37 = vmax.f32 %v774_v3, 0.0  ;;  %1197 = vperm.xlu2 %1576, %v1191_v22  }
 0x1ae   : > { %v893_v5 = vpack.c.bf16 %v845_v53, %v843_v1  ;;  %v1033_v1 = vpop.permute.xlu1 %1032 }
 0x1af   : > { %935 = vmatmul.bf16.vlgmr.msrb.gmra.mxu2 %v1490_v44  ;;  %v894_v41 = vpack.c.bf16 %v846_v37, %v844_v24 }
 0x1b0   : > { %965 = vmatpush.bf16.msra.mxu2 %v890_v32  ;;  %v1499_v32 = vld [vmem:[%s1904_s5 + $0x18] sm:$0xf0] }
 0x1b1   : > { %v1502_v12 = vor.u32 %v1541_v28, %v1499_v32 }
 0x1b3   : > { %v688_v43 = vpop.f32.mrf.mxu0 }
 0x1b4   : > { %966 = vmatpush.bf16.msra.mxu2 %v888_v40  ;;  %v777_v19 = vpop.f32.mrf.mxu1  ;;  %v842_v40 = vmax.f32 %v1832_v50, 0.0 }
 0x1b5   : > { %v848_v33 = vmax.f32 %v777_v19, 0.0 }
 0x1b8   : > { %967 = vmatpush.bf16.msra.mxu2 %v886_v42  ;;  %v892_v42 = vpack.c.bf16 %v842_v40, %v840_v39 }
 0x1bb   : > { %v690_v48 = vpop.f32.mrf.mxu0 }
 0x1bc   : > { %968 = vmatpush.bf16.msra.mxu2 %v884_v47  ;;  %v849_v59 = vmax.f32 %v690_v48, 0.0  ;;  %v779_v31 = vpop.f32.mrf.mxu1 }
 0x1bd   : > { %v850_v36 = vmax.f32 %v779_v31, 0.0 }
 0x1bf   : > { %940 = vmatmul.bf16.gmra.mxu2 %v1498_v55  ;;  %v896_v38 = vpack.c.bf16 %v850_v36, %v848_v33 }
 0x1c0   : > { %969 = vmatpush.bf16.msra.mxu2 %v1796_v35  ;;  %v802_v35 = vpop.f32.mrf.mxu3 }
 0x1c1   : > { %v868_v6 = vmax.f32 %v802_v35, 0.0 }
 0x1c3   : > { %v693_v51 = vpop.f32.mrf.mxu0 }
 0x1c4   : > { %970 = vmatpush.bf16.msra.mxu2 %v1793_v23  ;;  %v851_v58 = vmax.f32 %v693_v51, 0.0 }
 0x1c8   : > { %971 = vmatpush.bf16.msra.mxu2 %v1784_v10  ;;  %v847_v10 = vmax.f32 %v688_v43, 0.0  ;;  %v804_v2 = vpop.f32.mrf.mxu3 }
 0x1ca   : > { %v895_v62 = vpack.c.bf16 %v849_v59, %v847_v10 }
 0x1cb   : > { %v695_v57 = vpop.f32.mrf.mxu0 }
 0x1cc   : > { %972 = vmatpush.bf16.msra.mxu2 %v1772_v61  ;;  %v853_v23 = vmax.f32 %v695_v57, 0.0  ;;  %v870_v61 = vmax.f32 %v804_v2, 0.0  ;;  %v1028_v57 = vpop.permute.xlu0 %1027 }
 0x1ce   : > { %v897_v63 = vpack.c.bf16 %v853_v23, %v851_v58  ;;  %v906_v17 = vpack.c.bf16 %v870_v61, %v868_v6 }
 0x1cf   : > { %973 = vmatmul.bf16.vlgmr.msra.gmra.mxu2 %v1490_v44 }
 0x1d0   : > { %950 = vmatpush.bf16.msrb.mxu3 %v897_v63 }
 0x1d4   : > { %951 = vmatpush.bf16.msrb.mxu3 %v895_v62 }
 0x1d8   : > { %952 = vmatpush.bf16.msrb.mxu3 %v893_v5 }
 0x1dc   : > { %953 = vmatpush.bf16.msrb.mxu3 %v891_v13 }
 0x1df   : > { %954 = vmatmul.bf16.vlgmr.msrb.gmra.mxu3 %v1494_v18  ;;  %978 = vmatmul.bf16.gmra.mxu2 %v1498_v55 }
 0x1e0   : > { %984 = vmatpush.bf16.msra.mxu3 %v906_v17 }
 0x1e4   : > { %985 = vmatpush.bf16.msra.mxu3 %v904_v21 }
 0x1e8   : > { %986 = vmatpush.bf16.msra.mxu3 %v902_v29 }
 0x1ec   : > { %987 = vmatpush.bf16.msra.mxu3 %v900_v30 }
 0x1ef   : > { %959 = vmatmul.bf16.gmra.mxu3 %v1502_v12 }
 0x1f0   : > { %988 = vmatpush.bf16.msra.mxu3 %v1804_v0  ;;  %v1194_v0 = vld [vmem:[%s1906_s7 + $0x18] sm:$0xff] }
 0x1f1   : > { %1212 = vperm.xlu2 %1576, %v1194_v0  }
 0x1f4   : > { %989 = vmatpush.bf16.msra.mxu3 %v896_v38 }
 0x1f7   : > { %v1018_v46 = vpop.permute.xlu2 %1017 }
 0x1f8   : > { %990 = vmatpush.bf16.msra.mxu3 %v894_v41 }
 0x1fc   : > { %991 = vmatpush.bf16.msra.mxu3 %v892_v42 }
 0x1ff   : > { %992 = vmatmul.bf16.vlgmr.msra.gmra.mxu3 %v1494_v18  ;;  %v1023_v54 = vpop.permute.xlu2 %1022 }
 0x20f   : > { %997 = vmatmul.bf16.gmra.mxu3 %v1502_v12 }
 0x232   : > { %v936_v43 = vpop.f32.mrf.mxu2 }
 0x23a   : > { %v938_v9 = vpop.f32.mrf.mxu2 }
 0x242   : > { %v941_v44 = vpop.f32.mrf.mxu2 }
 0x24a   : > { %v943_v48 = vpop.f32.mrf.mxu2 }
 0x252   : > { %v974_v10 = vpop.f32.mrf.mxu2 }
 0x25a   : > { %v976_v7 = vpop.f32.mrf.mxu2 }
 0x262   : > { %v955_v60 = vpop.f32.mrf.mxu3  ;;  %v979_v18 = vpop.f32.mrf.mxu2 }
 0x263   : > { %v956_v50 = vadd.f32 %v955_v60, %v936_v43 }
 0x265   : > { %v1003_v55 = vmax.f32 %v956_v50, 0.0  ;;  %v1102_v50 = vld [vmem:[%s398_s11 + $0x8] sm:$0xff] }
 0x267   : > { %v1035_v23 = vmul.f32 %v1018_v46, %v1003_v55 }
 0x26a   : > { %v957_v45 = vpop.f32.mrf.mxu3  ;;  %v981_v32 = vpop.f32.mrf.mxu2 }
 0x26b   : > { %v958_v47 = vadd.f32 %v957_v45, %v938_v9  ;;  %v1103_v9 = vld [vmem:[%s398_s11 + $0x10] sm:$0xff] }
 0x26d   : > { %v1005_v52 = vmax.f32 %v958_v47, 0.0 }
 0x26f   : > { %v1037_v56 = vmul.f32 %v1023_v54, %v1005_v52 }
 0x271   : > { %v1043_v53 = vadd.f32 %v1037_v56, %v1035_v23 }
 0x272   : > { %v960_v49 = vpop.f32.mrf.mxu3 }
 0x273   : > { %v961_v51 = vadd.f32 %v960_v49, %v941_v44  ;;  %v1104_v44 = vld [vmem:[%s398_s11 + $0x18] sm:$0xff]  ;;  %v1109_v49 = vunpack.c.l.bf16 %v1103_v9 }
 0x275   : > { %v1007_v35 = vmax.f32 %v961_v51, 0.0 }
 0x277   : > { %v1039_v59 = vmul.f32 %v1028_v57, %v1007_v35 }
 0x279   : > { %v1044_v2 = vadd.f32 %v1043_v53, %v1039_v59 }
 0x27a   : > { %v962_v58 = vpop.f32.mrf.mxu3 }
 0x27b   : > { %v963_v63 = vadd.f32 %v962_v58, %v943_v48  ;;  %v1101_v48 = vld [vmem:[%s398_s11] sm:$0xff]  ;;  %v1107_v58 = vunpack.c.l.bf16 %v1102_v50 }
 0x27c   : > { %v1105_v35 = vunpack.c.l.bf16 %v1101_v48 }
 0x27d   : > { %v1009_v62 = vmax.f32 %v963_v63, 0.0 }
 0x27f   : > { %v1041_v3 = vmul.f32 %v1033_v1, %v1009_v62 }
 0x281   : > { %v1045_v4 = vadd.f32 %v1044_v2, %v1041_v3 }
 0x282   : > { %v993_v5 = vpop.f32.mrf.mxu3 }
 0x283   : > { %v1046_v6 = vrot.slane %v1045_v4, 4  ;;  %v994_v21 = vadd.f32 %v993_v5, %v974_v10  ;;  %v1543_v5 = vld [vmem:[%s1905_s6] sm:$0xff] }
 0x285   : > { %v1047_v61 = vadd.f32 %v1046_v6, %v1045_v4  ;;  %v1004_v27 = vmax.f32 %v994_v21, 0.0 }
 0x287   : > { %v1048_v8 = vrot.slane %v1047_v61, 2  ;;  %v1036_v36 = vmul.f32 %v1018_v46, %v1004_v27 }
 0x289   : > { %v1049_v11 = vadd.f32 %v1048_v8, %v1047_v61 }
 0x28a   : > { %v995_v13 = vpop.f32.mrf.mxu3 }
 0x28b   : > { %v1050_v14 = vrot.slane %v1049_v11, 1  ;;  %v996_v16 = vadd.f32 %v995_v13, %v976_v7 }
 0x28d   : > { %v1051_v15 = vadd.f32 %v1050_v14, %v1049_v11  ;;  %v1006_v26 = vmax.f32 %v996_v16, 0.0  ;;  %v1544_v11 = vld [vmem:[%s1905_s6 + $0x8] sm:$0xff]  ;;  %v1112_v16 = vunpack.c.h.bf16 %v1104_v44 }
 0x28f   : > { %v1503_v17 = vmul.f32 -0.17677669, %v1051_v15  ;;  %v1038_v31 = vmul.f32 %v1023_v54, %v1006_v26  ;;  %v1111_v54 = vunpack.c.l.bf16 %v1104_v44  ;;  %v1108_v26 = vunpack.c.h.bf16 %v1102_v50 }
 0x291   : > { %v1065_v19 = vmul.f32 1.442695, %v1503_v17  ;;  %v1052_v37 = vadd.f32 %v1038_v31, %v1036_v36 }
 0x292   : > { %v998_v20 = vpop.f32.mrf.mxu3 }
 0x293   : > { %1577 = vpow2.f32 %v1065_v19  ;;  %v999_v25 = vadd.f32 %v998_v20, %v979_v18  ;;  %v1110_v19 = vunpack.c.h.bf16 %v1103_v9  ;;  %v1208_v9 = vpop.permute.xlu1 %1207 }
 0x295   : > { %v1008_v29 = vmax.f32 %v999_v25, 0.0  ;;  %v1106_v25 = vunpack.c.h.bf16 %v1101_v48 }
 0x297   : > { %v1040_v12 = vmul.f32 %v1028_v57, %v1008_v29 }
 0x299   : > { %v1578_v30 = vpop.eup %1577  ;;  %v1053_v34 = vadd.f32 %v1052_v37, %v1040_v12 }
 0x29a   : > { %v1069_v28 = vadd.f32 1.0, %v1578_v30  ;;  %v1000_v33 = vpop.f32.mrf.mxu3 }
 0x29b   : > { %v1001_v24 = vadd.f32 %v1000_v33, %v981_v32 }
 0x29c   : > { %1579 = vrcp.f32 %v1069_v28  ;;  %v1082_v60 = vand.u32 2147483648, %v1069_v28  ;;  %v1080_v47 = vand.u32 2147483647, %v1069_v28  ;;  %vm1076_vm2 = vweird.f32 %v1069_v28 }
 0x29d   : > { %v1010_v38 = vmax.f32 %v1001_v24, 0.0 }
 0x29e   : > { %v1083_v55 = vor.u32 1.1754944e-38, %v1082_v60  ;;  %vm1081_vm4 = vcmp.eq.f32.partialorder %v1080_v47, 8.507059e+37 }
 0x29f   : > { %v1042_v39 = vmul.f32 %v1033_v1, %v1010_v38  ;;  %v1198_v38 = vpop.permute.xlu2 %1197 }
 0x2a1   : > { %v1054_v40 = vadd.f32 %v1053_v34, %v1042_v39 }
 0x2a2   : > { %v1580_v41 = vpop.eup %1579 }
 0x2a3   : > { %v1055_v22 = vrot.slane %v1054_v40, 4  ;;  %v1072_v42 = vmul.f32 %v1580_v41, %v1069_v28  ;;  %vm1077_vm1 = vweird.f32 %v1580_v41 }
 0x2a4   : > { %vm1078_vm3 = vmor %vm1076_vm2, %vm1077_vm1 }
 0x2a5   : > { %v1056_v0 = vadd.f32 %v1055_v22, %v1054_v40  ;;  %v1073_v43 = vsub.f32 1.0, %v1072_v42  ;;  %v1203_v22 = vpop.permute.xlu0 %1202 }
 0x2a7   : > { %v1057_v45 = vrot.slane %v1056_v0, 2  ;;  %v1074_v46 = vmul.f32 %v1580_v41, %v1073_v43 }
 0x2a9   : > { %v1058_v51 = vadd.f32 %v1057_v45, %v1056_v0  ;;  %v1075_v52 = vadd.f32 %v1580_v41, %v1074_v46  ;;  %v1213_v45 = vpop.permute.xlu2 %1212 }
 0x2ab   : > { %v1059_v56 = vrot.slane %v1058_v51, 1  ;;  %v1079_v57 = vsel %vm1078_vm3, %v1580_v41, %v1075_v52 }
 0x2ac   : > { %v1084_v23 = vsel %vm1081_vm4, %v1083_v55, %v1079_v57 }
 0x2ad   : > { %v1060_v59 = vadd.f32 %v1059_v56, %v1058_v51  ;;  %v1117_v63 = vmul.f32 %v1109_v49, %v1084_v23  ;;  %v1119_v10 = vmul.f32 %v1111_v54, %v1084_v23  ;;  %v1113_v1 = vmul.f32 %v1105_v35, %v1084_v23 }
 0x2ae   : > { %v1115_v2 = vmul.f32 %v1107_v58, %v1084_v23 }
 0x2af   : > { %v1504_v53 = vmul.f32 -0.17677669, %v1060_v59  ;;  %v1123_v62 = vpack.c.bf16 %v1119_v10, %v1117_v63 }
 0x2b0   : > { %v1121_v4 = vpack.c.bf16 %v1115_v2, %v1113_v1 }
 0x2b1   : > { %v1067_v3 = vmul.f32 1.442695, %v1504_v53  ;;  %1151 = vmatpush.bf16.msrb.mxu2 %v1123_v62 }
 0x2b3   : > { %1581 = vpow2.f32 %v1067_v3 }
 0x2b5   : > { %1152 = vmatpush.bf16.msrb.mxu2 %v1121_v4 }
 0x2b8   : > { %1513 = vmatmul.msk.bf16.vlgmr.msrb.gmra.mxu2 %vm580_vm0, %v1543_v5 }
 0x2b9   : > { %v1582_v6 = vpop.eup %1581 }
 0x2ba   : > { %v1070_v61 = vadd.f32 1.0, %v1582_v6 }
 0x2bc   : > { %1583 = vrcp.f32 %v1070_v61  ;;  %v1097_v14 = vand.u32 2147483648, %v1070_v61  ;;  %v1095_v17 = vand.u32 2147483647, %v1070_v61  ;;  %vm1091_vm6 = vweird.f32 %v1070_v61 }
 0x2be   : > { %v1098_v20 = vor.u32 1.1754944e-38, %v1097_v14  ;;  %vm1096_vm8 = vcmp.eq.f32.partialorder %v1095_v17, 8.507059e+37 }
 0x2c2   : > { %v1584_v7 = vpop.eup %1583 }
 0x2c3   : > { %v1087_v8 = vmul.f32 %v1584_v7, %v1070_v61  ;;  %vm1092_vm5 = vweird.f32 %v1584_v7 }
 0x2c4   : > { %vm1093_vm7 = vmor %vm1091_vm6, %vm1092_vm5 }
 0x2c5   : > { %v1088_v13 = vsub.f32 1.0, %v1087_v8 }
 0x2c7   : > { %v1089_v15 = vmul.f32 %v1584_v7, %v1088_v13  ;;  %v1249_v13 = vlaneseq }
 0x2c8   : > { %1514 = vmatmul.msk.bf16.gmra.mxu2 %vm580_vm0, %v1544_v11 }
 0x2c9   : > { %v1090_v18 = vadd.f32 %v1584_v7, %v1089_v15  ;;  %vm1251_vm10 = vcmp.lt.s32.totalorder %v1249_v13, 256 }
 0x2cb   : > { %v1094_v21 = vsel %vm1093_vm7, %v1584_v7, %v1090_v18 }
 0x2cc   : > { %v1099_v27 = vsel %vm1096_vm8, %v1098_v20, %v1094_v21 }
 0x2cd   : > { %v1118_v29 = vmul.f32 %v1110_v19, %v1099_v27  ;;  %v1120_v30 = vmul.f32 %v1112_v16, %v1099_v27  ;;  %v1114_v28 = vmul.f32 %v1106_v25, %v1099_v27  ;;  %v1116_v32 = vmul.f32 %v1108_v26, %v1099_v27 }
 0x2cf   : > { %v1124_v31 = vpack.c.bf16 %v1120_v30, %v1118_v29  ;;  %v1122_v33 = vpack.c.bf16 %v1116_v32, %v1114_v28 }
 0x2d1   : > { %1170 = vmatpush.bf16.msrb.mxu3 %v1124_v31 }
 0x2d5   : > { %1171 = vmatpush.bf16.msrb.mxu3 %v1122_v33 }
 0x2d8   : > { %1515 = vmatmul.msk.bf16.vlgmr.msrb.gmra.mxu3 %vm580_vm0, %v1543_v5 }
 0x2e8   : > { %1516 = vmatmul.msk.bf16.gmra.mxu3 %vm580_vm0, %v1544_v11 }
 0x33b   : > { %v1154_v36 = vpop.f32.mrf.mxu2 }
 0x33c   : > { %v1183_v40 = vmax.f32 %v1154_v36, 0.0 }
 0x33e   : > { %v1215_v60 = vmul.f32 %v1198_v38, %v1183_v40 }
 0x343   : > { %v1156_v12 = vpop.f32.mrf.mxu2 }
 0x344   : > { %v1185_v34 = vmax.f32 %v1156_v12, 0.0 }
 0x346   : > { %v1217_v0 = vmul.f32 %v1203_v22, %v1185_v34 }
 0x348   : > { %v1223_v46 = vadd.f32 %v1217_v0, %v1215_v60 }
 0x34b   : > { %v1159_v24 = vpop.f32.mrf.mxu2 }
 0x34c   : > { %v1187_v41 = vmax.f32 %v1159_v24, 0.0 }
 0x34e   : > { %v1219_v44 = vmul.f32 %v1208_v9, %v1187_v41 }
 0x350   : > { %v1224_v48 = vadd.f32 %v1223_v46, %v1219_v44 }
 0x353   : > { %v1161_v39 = vpop.f32.mrf.mxu2 }
 0x354   : > { %v1189_v43 = vmax.f32 %v1161_v39, 0.0 }
 0x356   : > { %v1221_v47 = vmul.f32 %v1213_v45, %v1189_v43 }
 0x358   : > { %v1225_v50 = vadd.f32 %v1224_v48, %v1221_v47 }
 0x35a   : > { %v1226_v55 = vrot.slane %v1225_v50, 4 }
 0x35b   : > { %v1173_v37 = vpop.f32.mrf.mxu3 }
 0x35c   : > { %v1184_v52 = vmax.f32 %v1173_v37, 0.0  ;;  %v1227_v23 = vadd.f32 %v1226_v55, %v1225_v50 }
 0x35e   : > { %v1216_v56 = vmul.f32 %v1198_v38, %v1184_v52  ;;  %v1228_v62 = vrot.slane %v1227_v23, 2 }
 0x360   : > { %v1229_v3 = vadd.f32 %v1228_v62, %v1227_v23 }
 0x362   : > { %v1230_v6 = vrot.slane %v1229_v3, 1 }
 0x363   : > { %v1175_v42 = vpop.f32.mrf.mxu3 }
 0x364   : > { %v1186_v51 = vmax.f32 %v1175_v42, 0.0  ;;  %v1231_v8 = vadd.f32 %v1230_v6, %v1229_v3 }
 0x366   : > { %v1218_v35 = vmul.f32 %v1203_v22, %v1186_v51  ;;  %v1241_v15 = vmax.f32 %v1231_v8, 0.0 }
 0x368   : > { %v1232_v59 = vadd.f32 %v1218_v35, %v1216_v56 }
 0x36b   : > { %v1178_v49 = vpop.f32.mrf.mxu3 }
 0x36c   : > { %v1188_v54 = vmax.f32 %v1178_v49, 0.0 }
 0x36e   : > { %v1220_v57 = vmul.f32 %v1208_v9, %v1188_v54 }
 0x370   : > { %v1233_v10 = vadd.f32 %v1232_v59, %v1220_v57 }
 0x373   : > { %v1180_v58 = vpop.f32.mrf.mxu3 }
 0x374   : > { %v1190_v63 = vmax.f32 %v1180_v58, 0.0 }
 0x376   : > { %v1222_v53 = vmul.f32 %v1213_v45, %v1190_v63 }
 0x378   : > { %v1234_v1 = vadd.f32 %v1233_v10, %v1222_v53 }
 0x37a   : > { %v1235_v2 = vrot.slane %v1234_v1, 4 }
 0x37c   : > { %v1236_v4 = vadd.f32 %v1235_v2, %v1234_v1 }
 0x37e   : > { %v1237_v5 = vrot.slane %v1236_v4, 2 }
 0x380   : > { %v1238_v61 = vadd.f32 %v1237_v5, %v1236_v4 }
 0x382   : > { %v1239_v7 = vrot.slane %v1238_v61, 1 }
 0x384   : > { %v1240_v11 = vadd.f32 %v1239_v7, %v1238_v61 }
 0x386   : > { %v1242_v14 = vmax.f32 %v1240_v11, 0.0 }
 0x388   : > { %v1245_v17 = vrot.slane %v1242_v14, 7 }
 0x38a   : > { %v1247_v18 = vsel %vm1246_vm9, %v1241_v15, %v1245_v17 }
 0x38b   : > { %1253 = vst.msk [vmem:[%s417_s19] sm:$0x3] %vm1251_vm10, %v1247_v18 }
 0x38c PF: > { %s18_s29 = sadd.s32 1, %s1607_s29   ;;  %s1908_s27 = smov %s1603_s28 }
 0x38d   : > { %p15_p5 = scmp.ge.s32.totalorder %s18_s29, 4   ;;  %s1909_s28 = smov %s1911_s30 }
 0x38f   :  { %17 = sbr.rel (!%p15_p5) target bundleno = 2 (0x2), region = 91 }

</bundles_post_ra>
